<compile_context>
chip_gen: v6e
topology: v6e:2x2x1
jax: 0.10.0
libtpu: 0.0.40
codegen_flags: <defaults>
</compile_context>

<pallas_src>
import numpy as np
import jax
import jax.numpy as jnp
from jax import lax
from jax.experimental import pallas as pl
from jax.experimental.pallas import tpu as pltpu

_BIG = 1e30          # sentinel for padded codebook rows (score -> -0.5*BIG)
_LANE = 128


def _round_up(v, m):
    return ((v + m - 1) // m) * m


def _pick_token_tile(hw, max_tile=1024):
    """Largest multiple of 128 that divides hw (<= max_tile); else the full hw."""
    cand = (min(hw, max_tile) // _LANE) * _LANE
    while cand >= _LANE:
        if hw % cand == 0:
            return cand
        cand -= _LANE
    return hw


# ----------------------------------------------------------------------------
# Kernel A: nearest-code assignment + codebook stats + scalar reductions
# ----------------------------------------------------------------------------
def _assign_kernel(x_ref, e_ref, hs_ref,
                   idx_ref, ks_ref, ke_ref, ssq_ref, sms_ref):
    # x_ref : (1, D, T)   activation tile, tokens on the lane axis (all real)
    # e_ref : (Kp, D)     codebook (padded rows masked via hs)
    # hs_ref: (Kp, 1)     0.5*|e_k|^2   (+0.5*BIG for padded rows)
    # idx_ref: (1, 1, T)  per-token nearest code, lane-dense
    # ks_ref : (1, Kp, D) per-image sum_{t in code k} x_t     (resident over T)
    # ke_ref : (1, Kp, 1) per-image counts per code
    # ssq_ref: (1, 1, 1)  per-image sum(x^2)
    # sms_ref: (1, 1, 1)  per-image sum over tokens of max score
    t = pl.program_id(1)

    x = x_ref[0]                                               # (D, T)
    e = e_ref[...]                                             # (Kp, D)
    kp = e.shape[0]

    # score[k, t] = <e_k, x_t> - 0.5*|e_k|^2 ; argmax == argmin distance
    sim = lax.dot_general(e, x, (((1,), (0,)), ((), ())),
                          preferred_element_type=jnp.float32)  # (Kp, T) MXU
    score = sim - hs_ref[...]                                  # lane broadcast

    best = jnp.max(score, axis=0, keepdims=True)               # (1, T)
    kio = lax.broadcasted_iota(jnp.int32, score.shape, 0)      # (Kp, T)
    idx = jnp.min(jnp.where(score == best, kio, kp),
                  axis=0, keepdims=True)                       # first-occurrence
    idx_ref[0] = idx

    onehotT = (kio == idx).astype(x.dtype)                     # (Kp, T), exact

    @pl.when(t == 0)
    def _():
        ks_ref[...] = jnp.zeros_like(ks_ref)
        ke_ref[...] = jnp.zeros_like(ke_ref)
        ssq_ref[...] = jnp.zeros_like(ssq_ref)
        sms_ref[...] = jnp.zeros_like(sms_ref)

    # per-code sums (MXU) and counts (one XLU reduce), f32 accumulation
    ks_ref[0] += lax.dot_general(onehotT, x, (((1,), (1,)), ((), ())),
                                 preferred_element_type=jnp.float32)   # (Kp, D)
    ke_ref[0] += jnp.sum(onehotT.astype(jnp.float32), axis=1, keepdims=True)

    xf = x.astype(jnp.float32)
    ssq_ref[0] += jnp.sum(jnp.sum(xf * xf, axis=0, keepdims=True),
                          axis=1, keepdims=True)               # (1, 1)
    sms_ref[0] += jnp.sum(best, axis=1, keepdims=True)         # (1, 1)


def assign_codes(x_view, e_pad, half_sq, *, t_tok):
    N, D, HW = x_view.shape
    Kp = e_pad.shape[0]
    T = HW // t_tok

    return pl.pallas_call(
        _assign_kernel,
        out_shape=(
            jax.ShapeDtypeStruct((N, 1, HW), jnp.int32),      # idx
            jax.ShapeDtypeStruct((N, Kp, D), jnp.float32),    # per-image k_sum
            jax.ShapeDtypeStruct((N, Kp, 1), jnp.float32),    # per-image k_elem
            jax.ShapeDtypeStruct((N, 1, 1), jnp.float32),     # per-image sum(x^2)
            jax.ShapeDtypeStruct((N, 1, 1), jnp.float32),     # per-image sum(best)
        ),
        grid=(N, T),
        in_specs=[
            pl.BlockSpec((1, D, t_tok), lambda n, t: (n, 0, t)),
            pl.BlockSpec((Kp, D), lambda n, t: (0, 0)),
            pl.BlockSpec((Kp, 1), lambda n, t: (0, 0)),
        ],
        out_specs=(
            pl.BlockSpec((1, 1, t_tok), lambda n, t: (n, 0, t)),
            pl.BlockSpec((1, Kp, D), lambda n, t: (n, 0, 0)),
            pl.BlockSpec((1, Kp, 1), lambda n, t: (n, 0, 0)),
            pl.BlockSpec((1, 1, 1), lambda n, t: (n, 0, 0)),
            pl.BlockSpec((1, 1, 1), lambda n, t: (n, 0, 0)),
        ),
        compiler_params=pltpu.CompilerParams(
            dimension_semantics=("parallel", "arbitrary")),
    )(x_view, e_pad, half_sq)


# ----------------------------------------------------------------------------
# Kernel B: lookup with UPDATED codebook + straight-through out + loss SSE
# ----------------------------------------------------------------------------
def _lookup_kernel(idx_ref, et_ref, x_ref, q_ref, o_ref, sse_ref):
    # idx_ref: (1, 1, T)  code indices;   et_ref: (D, Kp) updated codebook^T
    # x_ref  : (1, D, T)  matching activation tile
    # q_ref/o_ref: (1, D, T)  quantized / straight-through output (NCHW layout)
    # sse_ref: (1, 1, 1)  per-image sum((quantized - x)^2)
    t = pl.program_id(1)
    idx = idx_ref[0]                                           # (1, T)
    et = et_ref[...]                                           # (D, Kp)
    x = x_ref[0]                                               # (D, T)
    kp = et.shape[1]

    kio = lax.broadcasted_iota(jnp.int32, (kp, idx.shape[1]), 0)
    onehotT = (kio == idx).astype(et.dtype)                    # (Kp, T)
    q = lax.dot_general(et, onehotT, (((1,), (0,)), ((), ())),
                        preferred_element_type=jnp.float32)    # (D, T) MXU
    qc = q.astype(x.dtype)
    q_ref[0] = qc.astype(q_ref.dtype)
    o_ref[0] = (x + (qc - x)).astype(o_ref.dtype)              # torch: x + (q - x).detach()

    @pl.when(t == 0)
    def _():
        sse_ref[...] = jnp.zeros_like(sse_ref)
    d = q - x.astype(jnp.float32)
    sse_ref[0] += jnp.sum(jnp.sum(d * d, axis=0, keepdims=True),
                          axis=1, keepdims=True)


def embed_codes(idx3, e_t, x_view, *, t_tok):
    N, D, HW = x_view.shape
    Kp = e_t.shape[1]
    T = HW // t_tok

    return pl.pallas_call(
        _lookup_kernel,
        out_shape=(
            jax.ShapeDtypeStruct((N, D, HW), x_view.dtype),    # quantized (NCHW view)
            jax.ShapeDtypeStruct((N, D, HW), x_view.dtype),    # straight-through out
            jax.ShapeDtypeStruct((N, 1, 1), jnp.float32),      # per-image SSE
        ),
        grid=(N, T),
        in_specs=[
            pl.BlockSpec((1, 1, t_tok), lambda n, t: (n, 0, t)),
            pl.BlockSpec((D, Kp), lambda n, t: (0, 0)),
            pl.BlockSpec((1, D, t_tok), lambda n, t: (n, 0, t)),
        ],
        out_specs=(
            pl.BlockSpec((1, D, t_tok), lambda n, t: (n, 0, t)),
            pl.BlockSpec((1, D, t_tok), lambda n, t: (n, 0, t)),
            pl.BlockSpec((1, 1, 1), lambda n, t: (n, 0, 0)),
        ),
        compiler_params=pltpu.CompilerParams(
            dimension_semantics=("parallel", "arbitrary")),
    )(idx3, e_t, x_view)


# ----------------------------------------------------------------------------
# Plain-JAX glue reproducing VectorQuantizer._forward semantics
# ----------------------------------------------------------------------------
def _k_rand_rows(x_view, K, key):
    """Random-restart candidates: K random tokens of x (torch's _tile + randperm)."""
    N, D, HW = x_view.shape
    M = N * HW
    k_noise, k_perm = jax.random.split(key)
    if M >= K:
        perm = jax.random.permutation(k_perm, M)[:K]
        rows = x_view[perm // HW, :, perm % HW]                # (K, D) gather only
        return rows.astype(jnp.float32)
    n_rep = (K + M - 1) // M
    std = 0.01 / np.sqrt(D)
    toks = jnp.transpose(x_view, (0, 2, 1)).reshape(M, D).astype(jnp.float32)
    y = jnp.tile(toks, (n_rep, 1)) + jax.random.normal(k_noise, (n_rep * M, D)) * std
    return jax.random.permutation(k_perm, y, axis=0)[:K]


def vq_forward(x, embeddings, *, beta=0.25, threshold=1.0, ema_update=True,
               random_restart=True, max_token_tile=1024, matmul_dtype=None,
               restart_key=None):
    """x: (N, C, H, W) with C == emb_dim.  Forward pass of VectorQuantizer."""
    N, C, H, W = x.shape
    K, D = embeddings.shape
    assert C == D  # TODO(synk): torch preprocess also supports C == 2*emb_dim (x1+x2)

    f32 = jnp.float32
    HW = H * W
    M = N * HW
    t_tok = _pick_token_tile(HW, max_token_tile)
    cdtype = x.dtype if matmul_dtype is None else matmul_dtype

    # zero-copy (N, D, HW) view: tokens on lanes, features on sublanes
    x_view = x.reshape(N, C, HW).astype(cdtype)

    # codebook padded to a lane-friendly Kp; pad rows masked via +BIG half-norm
    Kp = max(_LANE, _round_up(K, _LANE))   # TODO(synk): round to 256 on v6e for K>=256
    e_pad = jnp.pad(embeddings.astype(cdtype), ((0, Kp - K), (0, 0)))
    s2 = jnp.sum(embeddings.astype(f32) ** 2, axis=1)
    half_sq = jnp.concatenate(
        [0.5 * s2, jnp.full((Kp - K,), 0.5 * _BIG, f32)])[:, None]       # (Kp, 1)

    # ---- Pallas kernel A: assignment + stats + fused scalar reductions --------
    idx3, ks_n, ke_n, ssq_n, sms_n = assign_codes(x_view, e_pad, half_sq, t_tok=t_tok)

    idx = idx3.reshape(M)                              # (M,) int32, (n, h, w) order
    _k_sum = jnp.sum(ks_n, axis=0)[:K]                 # (K, D)
    _k_elem = jnp.sum(ke_n, axis=0)[:K, 0]             # (K,)
    ssq = jnp.sum(ssq_n)                               # sum(x^2) over all elements
    sms = jnp.sum(sms_n)                               # sum over tokens of max score
    sum_x = jnp.sum(ks_n)                              # sum(x): each token hits one code

    # fit = mean(min distance); min_dist_t = |x_t|^2 - 2*max_score_t (nan_to_num id.)
    fit = (ssq - 2.0 * sms) / M
    # prenorm = ||x - mean(x)||_F / sqrt(M*D)
    prenorm = jnp.sqrt(jnp.maximum(ssq - sum_x * sum_x / (M * D), 0.0)) / np.sqrt(M * D)

    # ---- update_codebook (K x D glue; dist.* collectives identity on 1 device) -
    k_sum0 = embeddings.astype(f32)        # init_codebook: k_sum = embeddings.clone()
    k_elem0 = jnp.ones((K,), f32)          #                k_elem = ones
    old_k = embeddings.astype(f32)
    k_sum = beta * k_sum0 + (1.0 - beta) * _k_sum
    k_elem = beta * k_elem0 + (1.0 - beta) * _k_elem
    usage = (k_elem[:, None] >= threshold).astype(f32)
    new_k = k_sum / k_elem[:, None]
    if random_restart:
        # TODO(synk): torch uses torch.randperm + dist.broadcast; jax PRNG stream differs.
        if restart_key is None:
            restart_key = jax.random.PRNGKey(1)
        _k_rand = _k_rand_rows(x_view, K, restart_key)
        new_k = usage * new_k + (1.0 - usage) * _k_rand
    new_embeddings = new_k

    _k_prob = _k_elem / jnp.sum(_k_elem)
    entropy = -jnp.sum(_k_prob * jnp.log(_k_prob + 1e-8))
    used_curr = jnp.sum(_k_elem >= threshold).astype(jnp.int32)
    usage_sum = jnp.sum(usage)
    dk = jnp.nan_to_num(jnp.linalg.norm(new_embeddings - old_k) / np.sqrt(K * D))

    # ---- Pallas kernel B: quantize with UPDATED embeddings, NCHW layout out ----
    e_t = jnp.pad(new_embeddings, ((0, Kp - K), (0, 0))).T.astype(cdtype)  # (D, Kp)
    qv, ov, sse_n = embed_codes(idx3, e_t, x_view, t_tok=t_tok)

    quantized = qv.reshape(N, C, H, W).astype(x.dtype)     # free reshape (NCHW)
    out = ov.reshape(N, C, H, W).astype(x.dtype)           # straight-through (fwd value)

    # TODO(synk): no custom_vjp for the pallas_calls — loss/out are forward-only.
    mse = jnp.sum(sse_n) / (N * C * H * W)
    commit_loss = beta * mse
    codebook_loss = 0.0 if ema_update else mse
    loss = commit_loss + codebook_loss

    metrics = dict(fit=fit, prenorm=prenorm, entropy=entropy,
                   used_curr=used_curr, usage=usage_sum, dk=dk)
    return out, quantized, loss, metrics, new_embeddings, idx


# ----------------------------------------------------------------------------
if __name__ == "__main__":
    key = jax.random.PRNGKey(0)
    k_x, k_e = jax.random.split(key)

    n_emb, emb_dim = 64, 32
    N, C, H, W = 2, emb_dim, 8, 8             # NCHW input, C == emb_dim
    M = N * H * W

    x = jax.random.normal(k_x, (N, C, H, W), jnp.float32)
    # deterministic non-zero codebook init (synthetic — no checkpoint load)
    embeddings = 0.5 * jax.random.normal(k_e, (n_emb, emb_dim), jnp.float32)

    fwd = jax.jit(lambda xx, ee: vq_forward(
        xx, ee, beta=0.25, threshold=1.0, ema_update=True, random_restart=True))
    out, quantized, loss, metrics, new_emb, idx = fwd(x, embeddings)
    jax.block_until_ready((out, quantized, loss, new_emb, idx,
                           metrics["fit"], metrics["prenorm"],
                           metrics["entropy"], metrics["dk"]))

    # shape checks
    assert out.shape == (N, C, H, W)
    assert quantized.shape == (N, C, H, W)
    assert idx.shape == (M,)
    assert bool(jnp.all((idx >= 0) & (idx < n_emb)))

    # correctness checks vs a plain-JAX reference (token order used here: n, h, w)
    flat_x = jnp.transpose(x, (0, 2, 3, 1)).reshape(-1, emb_dim)
    dist_ref = (jnp.sum(flat_x ** 2, axis=1, keepdims=True)
                + jnp.sum(embeddings ** 2, axis=1)[None, :]
                - 2.0 * flat_x @ embeddings.T)
    chosen = dist_ref[jnp.arange(M), idx]
    assert bool(jnp.allclose(chosen, jnp.min(dist_ref, axis=1), atol=1e-3, rtol=1e-4))
    assert bool(jnp.allclose(metrics["fit"], jnp.mean(jnp.min(dist_ref, axis=1)),
                             rtol=1e-3, atol=1e-3))
    prenorm_ref = jnp.linalg.norm(flat_x - jnp.mean(flat_x)) / np.sqrt(M * emb_dim)
    assert bool(jnp.allclose(metrics["prenorm"], prenorm_ref, rtol=1e-3, atol=1e-4))

    q_ref = jnp.transpose(new_emb[idx].reshape(N, H, W, C), (0, 3, 1, 2))
    assert bool(jnp.allclose(quantized, q_ref, atol=1e-5, rtol=1e-5))
    assert bool(jnp.allclose(out, quantized, atol=1e-5, rtol=1e-5))
    loss_ref = 0.25 * jnp.mean((q_ref - x) ** 2)
    assert bool(jnp.allclose(loss, loss_ref, rtol=1e-4, atol=1e-6))

    print("KERNEL_OK")
</pallas_src>

<mosaic_0001>
module attributes {stable_mosaic.version = 11 : i64} {
  func.func @_assign_kernel(%arg0: i32, %arg1: i32, %arg2: memref<1x32x64xf32, #tpu.memory_space<vmem>>, %arg3: memref<128x32xf32, #tpu.memory_space<vmem>>, %arg4: memref<128x1xf32, #tpu.memory_space<vmem>>, %arg5: memref<1x1x64xi32, #tpu.memory_space<vmem>>, %arg6: memref<1x128x32xf32, #tpu.memory_space<vmem>>, %arg7: memref<1x128x1xf32, #tpu.memory_space<vmem>>, %arg8: memref<1x1x1xf32, #tpu.memory_space<vmem>>, %arg9: memref<1x1x1xf32, #tpu.memory_space<vmem>>) attributes {dimension_semantics = [#tpu.dimension_semantics<parallel>, #tpu.dimension_semantics<arbitrary>], iteration_bounds = array<i64: 2, 1>, scalar_prefetch = 0 : i64, scratch_operands = 0 : i64, tpu.core_type = #tpu.core_type<tc>, window_params = [{transform_indices = @transform_0, window_bounds = array<i64: 1, 32, 64>}, {pipeline_mode = #tpu.pipeline_mode<synchronous>, transform_indices = @transform_1, window_bounds = array<i64: 128, 32>}, {pipeline_mode = #tpu.pipeline_mode<synchronous>, transform_indices = @transform_2, window_bounds = array<i64: 128, 1>}, {transform_indices = @transform_3, window_bounds = array<i64: 1, 1, 64>}, {transform_indices = @transform_4, window_bounds = array<i64: 1, 128, 32>}, {transform_indices = @transform_5, window_bounds = array<i64: 1, 128, 1>}, {transform_indices = @transform_6, window_bounds = array<i64: 1, 1, 1>}, {transform_indices = @transform_7, window_bounds = array<i64: 1, 1, 1>}]} {
    %c0 = arith.constant 0 : index
    %c0_0 = arith.constant 0 : index
    %c0_1 = arith.constant 0 : index
    %0 = vector.load %arg2[%c0, %c0_0, %c0_1] : memref<1x32x64xf32, #tpu.memory_space<vmem>>, vector<1x32x64xf32>
    %1 = vector.shape_cast %0 : vector<1x32x64xf32> to vector<32x64xf32>
    %c0_2 = arith.constant 0 : index
    %c0_3 = arith.constant 0 : index
    %2 = vector.load %arg3[%c0_2, %c0_3] : memref<128x32xf32, #tpu.memory_space<vmem>>, vector<128x32xf32>
    %cst = arith.constant dense<0.000000e+00> : vector<128x64xf32>
    %3 = tpu.matmul %2, %1, %cst {dimension_numbers = #tpu.dot_dimension_numbers<[1], [0], [0], [1], [0, 0, 1, 1], [], []>} : vector<128x32xf32>, vector<32x64xf32>, vector<128x64xf32> -> vector<128x64xf32>
    %c0_4 = arith.constant 0 : index
    %c0_5 = arith.constant 0 : index
    %4 = vector.load %arg4[%c0_4, %c0_5] : memref<128x1xf32, #tpu.memory_space<vmem>>, vector<128x1xf32>
    %5 = vector.broadcast %4 : vector<128x1xf32> to vector<128x64xf32>
    %6 = arith.subf %3, %5 : vector<128x64xf32>
    %cst_6 = arith.constant dense<0xFF800000> : vector<64xf32>
    %7 = vector.multi_reduction <maximumf>, %6, %cst_6 [0] : vector<128x64xf32> to vector<64xf32>
    %8 = vector.shape_cast %7 : vector<64xf32> to vector<1x64xf32>
    %9 = tpu.iota {dimensions = array<i32: 0>} : vector<128x64xi32>
    %10 = vector.broadcast %8 : vector<1x64xf32> to vector<128x64xf32>
    %11 = arith.cmpf oeq, %6, %10 : vector<128x64xf32>
    %c128_i32 = arith.constant 128 : i32
    %12 = vector.broadcast %c128_i32 : i32 to vector<128x64xi32>
    %13 = arith.select %11, %9, %12 : vector<128x64xi1>, vector<128x64xi32>
    %cst_7 = arith.constant dense<2147483647> : vector<64xi32>
    %14 = vector.multi_reduction <minsi>, %13, %cst_7 [0] : vector<128x64xi32> to vector<64xi32>
    %15 = vector.shape_cast %14 : vector<64xi32> to vector<1x64xi32>
    %c0_8 = arith.constant 0 : index
    %c0_9 = arith.constant 0 : index
    %c0_10 = arith.constant 0 : index
    %16 = vector.load %arg5[%c0_8, %c0_9, %c0_10] : memref<1x1x64xi32, #tpu.memory_space<vmem>>, vector<1x1x64xi32>
    %17 = vector.shape_cast %16 : vector<1x1x64xi32> to vector<1x64xi32>
    %18 = vector.shape_cast %15 : vector<1x64xi32> to vector<1x1x64xi32>
    tpu.vector_store %arg5[%c0_8, %c0_9, %c0_10], %18 {strides = array<i32>} : memref<1x1x64xi32, #tpu.memory_space<vmem>>, vector<1x1x64xi32>,
    %19 = vector.broadcast %15 : vector<1x64xi32> to vector<128x64xi32>
    %20 = arith.cmpi eq, %9, %19 : vector<128x64xi32>
    %21 = arith.extui %20 : vector<128x64xi1> to vector<128x64xi32>
    %22 = arith.sitofp %21 : vector<128x64xi32> to vector<128x64xf32>
    %c0_i32 = arith.constant 0 : i32
    %23 = arith.cmpi eq, %arg1, %c0_i32 : i32
    %24 = arith.extui %23 : i1 to i32
    %c0_i32_11 = arith.constant 0 : i32
    %25 = arith.cmpi ne, %24, %c0_i32_11 : i32
    scf.if %25 {
      %cst_41 = arith.constant 0.000000e+00 : f32
      %60 = vector.broadcast %cst_41 : f32 to vector<1x128x32xf32>
      %c0_42 = arith.constant 0 : index
      %c0_43 = arith.constant 0 : index
      %c0_44 = arith.constant 0 : index
      %61 = vector.load %arg6[%c0_42, %c0_43, %c0_44] : memref<1x128x32xf32, #tpu.memory_space<vmem>>, vector<1x128x32xf32>
      tpu.vector_store %arg6[%c0_42, %c0_43, %c0_44], %60 {strides = array<i32>} : memref<1x128x32xf32, #tpu.memory_space<vmem>>, vector<1x128x32xf32>,
      %cst_45 = arith.constant 0.000000e+00 : f32
      %62 = vector.broadcast %cst_45 : f32 to vector<1x128x1xf32>
      %c0_46 = arith.constant 0 : index
      %c0_47 = arith.constant 0 : index
      %c0_48 = arith.constant 0 : index
      %63 = vector.load %arg7[%c0_46, %c0_47, %c0_48] : memref<1x128x1xf32, #tpu.memory_space<vmem>>, vector<1x128x1xf32>
      tpu.vector_store %arg7[%c0_46, %c0_47, %c0_48], %62 {strides = array<i32>} : memref<1x128x1xf32, #tpu.memory_space<vmem>>, vector<1x128x1xf32>,
      %cst_49 = arith.constant 0.000000e+00 : f32
      %64 = vector.broadcast %cst_49 : f32 to vector<1x1x1xf32>
      %c0_50 = arith.constant 0 : index
      %c0_51 = arith.constant 0 : index
      %c0_52 = arith.constant 0 : index
      %65 = vector.load %arg8[%c0_50, %c0_51, %c0_52] : memref<1x1x1xf32, #tpu.memory_space<vmem>>, vector<1x1x1xf32>
      tpu.vector_store %arg8[%c0_50, %c0_51, %c0_52], %64 {strides = array<i32>} : memref<1x1x1xf32, #tpu.memory_space<vmem>>, vector<1x1x1xf32>,
      %cst_53 = arith.constant 0.000000e+00 : f32
      %66 = vector.broadcast %cst_53 : f32 to vector<1x1x1xf32>
      %c0_54 = arith.constant 0 : index
      %c0_55 = arith.constant 0 : index
      %c0_56 = arith.constant 0 : index
      %67 = vector.load %arg9[%c0_54, %c0_55, %c0_56] : memref<1x1x1xf32, #tpu.memory_space<vmem>>, vector<1x1x1xf32>
      tpu.vector_store %arg9[%c0_54, %c0_55, %c0_56], %66 {strides = array<i32>} : memref<1x1x1xf32, #tpu.memory_space<vmem>>, vector<1x1x1xf32>,
    } else {
    }
    %c0_12 = arith.constant 0 : index
    %c0_13 = arith.constant 0 : index
    %c0_14 = arith.constant 0 : index
    %26 = vector.load %arg6[%c0_12, %c0_13, %c0_14] : memref<1x128x32xf32, #tpu.memory_space<vmem>>, vector<1x128x32xf32>
    %27 = vector.shape_cast %26 : vector<1x128x32xf32> to vector<128x32xf32>
    %cst_15 = arith.constant dense<0.000000e+00> : vector<128x32xf32>
    %28 = tpu.matmul %22, %1, %cst_15 {dimension_numbers = #tpu.dot_dimension_numbers<[1], [1], [0], [0], [0, 0, 1, 0], [], []>} : vector<128x64xf32>, vector<32x64xf32>, vector<128x32xf32> -> vector<128x32xf32>
    %29 = arith.addf %27, %28 : vector<128x32xf32>
    %c0_16 = arith.constant 0 : index
    %c0_17 = arith.constant 0 : index
    %c0_18 = arith.constant 0 : index
    %30 = vector.load %arg6[%c0_16, %c0_17, %c0_18] : memref<1x128x32xf32, #tpu.memory_space<vmem>>, vector<1x128x32xf32>
    %31 = vector.shape_cast %30 : vector<1x128x32xf32> to vector<128x32xf32>
    %32 = vector.shape_cast %29 : vector<128x32xf32> to vector<1x128x32xf32>
    tpu.vector_store %arg6[%c0_16, %c0_17, %c0_18], %32 {strides = array<i32>} : memref<1x128x32xf32, #tpu.memory_space<vmem>>, vector<1x128x32xf32>,
    %c0_19 = arith.constant 0 : index
    %c0_20 = arith.constant 0 : index
    %c0_21 = arith.constant 0 : index
    %33 = vector.load %arg7[%c0_19, %c0_20, %c0_21] : memref<1x128x1xf32, #tpu.memory_space<vmem>>, vector<1x128x1xf32>
    %34 = vector.shape_cast %33 : vector<1x128x1xf32> to vector<128x1xf32>
    %cst_22 = arith.constant dense<0.000000e+00> : vector<128xf32>
    %35 = vector.multi_reduction <add>, %22, %cst_22 [1] : vector<128x64xf32> to vector<128xf32>
    %36 = vector.shape_cast %35 : vector<128xf32> to vector<128x1xf32>
    %37 = arith.addf %34, %36 : vector<128x1xf32>
    %c0_23 = arith.constant 0 : index
    %c0_24 = arith.constant 0 : index
    %c0_25 = arith.constant 0 : index
    %38 = vector.load %arg7[%c0_23, %c0_24, %c0_25] : memref<1x128x1xf32, #tpu.memory_space<vmem>>, vector<1x128x1xf32>
    %39 = vector.shape_cast %38 : vector<1x128x1xf32> to vector<128x1xf32>
    %40 = vector.shape_cast %37 : vector<128x1xf32> to vector<1x128x1xf32>
    tpu.vector_store %arg7[%c0_23, %c0_24, %c0_25], %40 {strides = array<i32>} : memref<1x128x1xf32, #tpu.memory_space<vmem>>, vector<1x128x1xf32>,
    %c0_26 = arith.constant 0 : index
    %c0_27 = arith.constant 0 : index
    %c0_28 = arith.constant 0 : index
    %41 = vector.load %arg8[%c0_26, %c0_27, %c0_28] : memref<1x1x1xf32, #tpu.memory_space<vmem>>, vector<1x1x1xf32>
    %42 = vector.shape_cast %41 : vector<1x1x1xf32> to vector<1x1xf32>
    %43 = arith.mulf %1, %1 : vector<32x64xf32>
    %cst_29 = arith.constant dense<0.000000e+00> : vector<64xf32>
    %44 = vector.multi_reduction <add>, %43, %cst_29 [0] : vector<32x64xf32> to vector<64xf32>
    %45 = vector.shape_cast %44 : vector<64xf32> to vector<1x64xf32>
    %cst_30 = arith.constant dense<0.000000e+00> : vector<1xf32>
    %46 = vector.multi_reduction <add>, %45, %cst_30 [1] : vector<1x64xf32> to vector<1xf32>
    %47 = vector.shape_cast %46 : vector<1xf32> to vector<1x1xf32>
    %48 = arith.addf %42, %47 : vector<1x1xf32>
    %c0_31 = arith.constant 0 : index
    %c0_32 = arith.constant 0 : index
    %c0_33 = arith.constant 0 : index
    %49 = vector.load %arg8[%c0_31, %c0_32, %c0_33] : memref<1x1x1xf32, #tpu.memory_space<vmem>>, vector<1x1x1xf32>
    %50 = vector.shape_cast %49 : vector<1x1x1xf32> to vector<1x1xf32>
    %51 = vector.shape_cast %48 : vector<1x1xf32> to vector<1x1x1xf32>
    tpu.vector_store %arg8[%c0_31, %c0_32, %c0_33], %51 {strides = array<i32>} : memref<1x1x1xf32, #tpu.memory_space<vmem>>, vector<1x1x1xf32>,
    %c0_34 = arith.constant 0 : index
    %c0_35 = arith.constant 0 : index
    %c0_36 = arith.constant 0 : index
    %52 = vector.load %arg9[%c0_34, %c0_35, %c0_36] : memref<1x1x1xf32, #tpu.memory_space<vmem>>, vector<1x1x1xf32>
    %53 = vector.shape_cast %52 : vector<1x1x1xf32> to vector<1x1xf32>
    %cst_37 = arith.constant dense<0.000000e+00> : vector<1xf32>
    %54 = vector.multi_reduction <add>, %8, %cst_37 [1] : vector<1x64xf32> to vector<1xf32>
    %55 = vector.shape_cast %54 : vector<1xf32> to vector<1x1xf32>
    %56 = arith.addf %53, %55 : vector<1x1xf32>
    %c0_38 = arith.constant 0 : index
    %c0_39 = arith.constant 0 : index
    %c0_40 = arith.constant 0 : index
    %57 = vector.load %arg9[%c0_38, %c0_39, %c0_40] : memref<1x1x1xf32, #tpu.memory_space<vmem>>, vector<1x1x1xf32>
    %58 = vector.shape_cast %57 : vector<1x1x1xf32> to vector<1x1xf32>
    %59 = vector.shape_cast %56 : vector<1x1xf32> to vector<1x1x1xf32>
    tpu.vector_store %arg9[%c0_38, %c0_39, %c0_40], %59 {strides = array<i32>} : memref<1x1x1xf32, #tpu.memory_space<vmem>>, vector<1x1x1xf32>,
    return
  }
  func.func @transform_0(%arg0: i32, %arg1: i32) -> (i32, i32, i32) {
    %c0_i32 = arith.constant 0 : i32
    %c0_i32_0 = arith.constant 0 : i32
    return %arg0, %c0_i32, %arg1 : i32, i32, i32
  }
  func.func @transform_1(%arg0: i32, %arg1: i32) -> (i32, i32) {
    %c0_i32 = arith.constant 0 : i32
    %c0_i32_0 = arith.constant 0 : i32
    %c0_i32_1 = arith.constant 0 : i32
    return %c0_i32, %c0_i32_0 : i32, i32
  }
  func.func @transform_2(%arg0: i32, %arg1: i32) -> (i32, i32) {
    %c0_i32 = arith.constant 0 : i32
    %c0_i32_0 = arith.constant 0 : i32
    %c0_i32_1 = arith.constant 0 : i32
    return %c0_i32, %c0_i32_0 : i32, i32
  }
  func.func @transform_3(%arg0: i32, %arg1: i32) -> (i32, i32, i32) {
    %c0_i32 = arith.constant 0 : i32
    %c0_i32_0 = arith.constant 0 : i32
    return %arg0, %c0_i32, %arg1 : i32, i32, i32
  }
  func.func @transform_4(%arg0: i32, %arg1: i32) -> (i32, i32, i32) {
    %c0_i32 = arith.constant 0 : i32
    %c0_i32_0 = arith.constant 0 : i32
    %c0_i32_1 = arith.constant 0 : i32
    return %arg0, %c0_i32, %c0_i32_0 : i32, i32, i32
  }
  func.func @transform_5(%arg0: i32, %arg1: i32) -> (i32, i32, i32) {
    %c0_i32 = arith.constant 0 : i32
    %c0_i32_0 = arith.constant 0 : i32
    %c0_i32_1 = arith.constant 0 : i32
    return %arg0, %c0_i32, %c0_i32_0 : i32, i32, i32
  }
  func.func @transform_6(%arg0: i32, %arg1: i32) -> (i32, i32, i32) {
    %c0_i32 = arith.constant 0 : i32
    %c0_i32_0 = arith.constant 0 : i32
    %c0_i32_1 = arith.constant 0 : i32
    return %arg0, %c0_i32, %c0_i32_0 : i32, i32, i32
  }
  func.func @transform_7(%arg0: i32, %arg1: i32) -> (i32, i32, i32) {
    %c0_i32 = arith.constant 0 : i32
    %c0_i32_0 = arith.constant 0 : i32
    %c0_i32_1 = arith.constant 0 : i32
    return %arg0, %c0_i32, %c0_i32_0 : i32, i32, i32
  }
}

module attributes {stable_mosaic.version = 11 : i64} {
  func.func @_lookup_kernel(%arg0: i32, %arg1: i32, %arg2: memref<1x1x64xi32, #tpu.memory_space<vmem>>, %arg3: memref<32x128xf32, #tpu.memory_space<vmem>>, %arg4: memref<1x32x64xf32, #tpu.memory_space<vmem>>, %arg5: memref<1x32x64xf32, #tpu.memory_space<vmem>>, %arg6: memref<1x32x64xf32, #tpu.memory_space<vmem>>, %arg7: memref<1x1x1xf32, #tpu.memory_space<vmem>>) attributes {dimension_semantics = [#tpu.dimension_semantics<parallel>, #tpu.dimension_semantics<arbitrary>], iteration_bounds = array<i64: 2, 1>, scalar_prefetch = 0 : i64, scratch_operands = 0 : i64, tpu.core_type = #tpu.core_type<tc>, window_params = [{transform_indices = @transform_0, window_bounds = array<i64: 1, 1, 64>}, {pipeline_mode = #tpu.pipeline_mode<synchronous>, transform_indices = @transform_1, window_bounds = array<i64: 32, 128>}, {transform_indices = @transform_2, window_bounds = array<i64: 1, 32, 64>}, {transform_indices = @transform_3, window_bounds = array<i64: 1, 32, 64>}, {transform_indices = @transform_4, window_bounds = array<i64: 1, 32, 64>}, {transform_indices = @transform_5, window_bounds = array<i64: 1, 1, 1>}]} {
    %c0 = arith.constant 0 : index
    %c0_0 = arith.constant 0 : index
    %c0_1 = arith.constant 0 : index
    %0 = vector.load %arg2[%c0, %c0_0, %c0_1] : memref<1x1x64xi32, #tpu.memory_space<vmem>>, vector<1x1x64xi32>
    %1 = vector.shape_cast %0 : vector<1x1x64xi32> to vector<1x64xi32>
    %c0_2 = arith.constant 0 : index
    %c0_3 = arith.constant 0 : index
    %2 = vector.load %arg3[%c0_2, %c0_3] : memref<32x128xf32, #tpu.memory_space<vmem>>, vector<32x128xf32>
    %c0_4 = arith.constant 0 : index
    %c0_5 = arith.constant 0 : index
    %c0_6 = arith.constant 0 : index
    %3 = vector.load %arg4[%c0_4, %c0_5, %c0_6] : memref<1x32x64xf32, #tpu.memory_space<vmem>>, vector<1x32x64xf32>
    %4 = vector.shape_cast %3 : vector<1x32x64xf32> to vector<32x64xf32>
    %5 = tpu.iota {dimensions = array<i32: 0>} : vector<128x64xi32>
    %6 = vector.broadcast %1 : vector<1x64xi32> to vector<128x64xi32>
    %7 = arith.cmpi eq, %5, %6 : vector<128x64xi32>
    %8 = arith.extui %7 : vector<128x64xi1> to vector<128x64xi32>
    %9 = arith.sitofp %8 : vector<128x64xi32> to vector<128x64xf32>
    %cst = arith.constant dense<0.000000e+00> : vector<32x64xf32>
    %10 = tpu.matmul %2, %9, %cst {dimension_numbers = #tpu.dot_dimension_numbers<[1], [0], [0], [1], [0, 0, 1, 1], [], []>} : vector<32x128xf32>, vector<128x64xf32>, vector<32x64xf32> -> vector<32x64xf32>
    %c0_7 = arith.constant 0 : index
    %c0_8 = arith.constant 0 : index
    %c0_9 = arith.constant 0 : index
    %11 = vector.load %arg5[%c0_7, %c0_8, %c0_9] : memref<1x32x64xf32, #tpu.memory_space<vmem>>, vector<1x32x64xf32>
    %12 = vector.shape_cast %11 : vector<1x32x64xf32> to vector<32x64xf32>
    %13 = vector.shape_cast %10 : vector<32x64xf32> to vector<1x32x64xf32>
    tpu.vector_store %arg5[%c0_7, %c0_8, %c0_9], %13 {strides = array<i32>} : memref<1x32x64xf32, #tpu.memory_space<vmem>>, vector<1x32x64xf32>,
    %14 = arith.subf %10, %4 : vector<32x64xf32>
    %15 = arith.addf %4, %14 : vector<32x64xf32>
    %c0_10 = arith.constant 0 : index
    %c0_11 = arith.constant 0 : index
    %c0_12 = arith.constant 0 : index
    %16 = vector.load %arg6[%c0_10, %c0_11, %c0_12] : memref<1x32x64xf32, #tpu.memory_space<vmem>>, vector<1x32x64xf32>
    %17 = vector.shape_cast %16 : vector<1x32x64xf32> to vector<32x64xf32>
    %18 = vector.shape_cast %15 : vector<32x64xf32> to vector<1x32x64xf32>
    tpu.vector_store %arg6[%c0_10, %c0_11, %c0_12], %18 {strides = array<i32>} : memref<1x32x64xf32, #tpu.memory_space<vmem>>, vector<1x32x64xf32>,
    %c0_i32 = arith.constant 0 : i32
    %19 = arith.cmpi eq, %arg1, %c0_i32 : i32
    %20 = arith.extui %19 : i1 to i32
    %c0_i32_13 = arith.constant 0 : i32
    %21 = arith.cmpi ne, %20, %c0_i32_13 : i32
    scf.if %21 {
      %cst_22 = arith.constant 0.000000e+00 : f32
      %34 = vector.broadcast %cst_22 : f32 to vector<1x1x1xf32>
      %c0_23 = arith.constant 0 : index
      %c0_24 = arith.constant 0 : index
      %c0_25 = arith.constant 0 : index
      %35 = vector.load %arg7[%c0_23, %c0_24, %c0_25] : memref<1x1x1xf32, #tpu.memory_space<vmem>>, vector<1x1x1xf32>
      tpu.vector_store %arg7[%c0_23, %c0_24, %c0_25], %34 {strides = array<i32>} : memref<1x1x1xf32, #tpu.memory_space<vmem>>, vector<1x1x1xf32>,
    } else {
    }
    %22 = arith.subf %10, %4 : vector<32x64xf32>
    %c0_14 = arith.constant 0 : index
    %c0_15 = arith.constant 0 : index
    %c0_16 = arith.constant 0 : index
    %23 = vector.load %arg7[%c0_14, %c0_15, %c0_16] : memref<1x1x1xf32, #tpu.memory_space<vmem>>, vector<1x1x1xf32>
    %24 = vector.shape_cast %23 : vector<1x1x1xf32> to vector<1x1xf32>
    %25 = arith.mulf %22, %22 : vector<32x64xf32>
    %cst_17 = arith.constant dense<0.000000e+00> : vector<64xf32>
    %26 = vector.multi_reduction <add>, %25, %cst_17 [0] : vector<32x64xf32> to vector<64xf32>
    %27 = vector.shape_cast %26 : vector<64xf32> to vector<1x64xf32>
    %cst_18 = arith.constant dense<0.000000e+00> : vector<1xf32>
    %28 = vector.multi_reduction <add>, %27, %cst_18 [1] : vector<1x64xf32> to vector<1xf32>
    %29 = vector.shape_cast %28 : vector<1xf32> to vector<1x1xf32>
    %30 = arith.addf %24, %29 : vector<1x1xf32>
    %c0_19 = arith.constant 0 : index
    %c0_20 = arith.constant 0 : index
    %c0_21 = arith.constant 0 : index
    %31 = vector.load %arg7[%c0_19, %c0_20, %c0_21] : memref<1x1x1xf32, #tpu.memory_space<vmem>>, vector<1x1x1xf32>
    %32 = vector.shape_cast %31 : vector<1x1x1xf32> to vector<1x1xf32>
    %33 = vector.shape_cast %30 : vector<1x1xf32> to vector<1x1x1xf32>
    tpu.vector_store %arg7[%c0_19, %c0_20, %c0_21], %33 {strides = array<i32>} : memref<1x1x1xf32, #tpu.memory_space<vmem>>, vector<1x1x1xf32>,
    return
  }
  func.func @transform_0(%arg0: i32, %arg1: i32) -> (i32, i32, i32) {
    %c0_i32 = arith.constant 0 : i32
    %c0_i32_0 = arith.constant 0 : i32
    return %arg0, %c0_i32, %arg1 : i32, i32, i32
  }
  func.func @transform_1(%arg0: i32, %arg1: i32) -> (i32, i32) {
    %c0_i32 = arith.constant 0 : i32
    %c0_i32_0 = arith.constant 0 : i32
    %c0_i32_1 = arith.constant 0 : i32
    return %c0_i32, %c0_i32_0 : i32, i32
  }
  func.func @transform_2(%arg0: i32, %arg1: i32) -> (i32, i32, i32) {
    %c0_i32 = arith.constant 0 : i32
    %c0_i32_0 = arith.constant 0 : i32
    return %arg0, %c0_i32, %arg1 : i32, i32, i32
  }
  func.func @transform_3(%arg0: i32, %arg1: i32) -> (i32, i32, i32) {
    %c0_i32 = arith.constant 0 : i32
    %c0_i32_0 = arith.constant 0 : i32
    return %arg0, %c0_i32, %arg1 : i32, i32, i32
  }
  func.func @transform_4(%arg0: i32, %arg1: i32) -> (i32, i32, i32) {
    %c0_i32 = arith.constant 0 : i32
    %c0_i32_0 = arith.constant 0 : i32
    return %arg0, %c0_i32, %arg1 : i32, i32, i32
  }
  func.func @transform_5(%arg0: i32, %arg1: i32) -> (i32, i32, i32) {
    %c0_i32 = arith.constant 0 : i32
    %c0_i32_0 = arith.constant 0 : i32
    %c0_i32_1 = arith.constant 0 : i32
    return %arg0, %c0_i32, %c0_i32_0 : i32, i32, i32
  }
}

</mosaic_0001>

<bundles_post_ra>
// kernel: _lambda_.2
= control target key start
LH: loop header
LB: loop body
LE: loop exit
PB: predicated region body
PF: predicated region fallthrough
CT: control target
= control target key end

     0   :  { %s1746_s24 = smov 0   ;;  %s1748_s25 = smov 0   ;;  %s2493_s0 = inlined_call_operand.vmem [shape: f32[2,32,64], index: 0, kind: input, shape index: {}]   ;;  %s2494_s1 = inlined_call_operand.vmem [shape: f32[128,32], index: 1, kind: input, shape index: {}]   ;;  %s2495_s2 = inlined_call_operand.vmem [shape: f32[128,1], index: 2, kind: input, shape index: {}]   ;;  %s2496_s3 = inlined_call_operand.vmem [shape: s32[2,1,64], index: 3, kind: output, shape index: {0}]   ;;  %s2497_s4 = inlined_call_operand.vmem [shape: f32[2,128,32], index: 4, kind: output, shape index: {1}]   ;;  %s2498_s5 = inlined_call_operand.vmem [shape: f32[2,128,1], index: 5, kind: output, shape index: {2}]   ;;  %s2499_s6 = inlined_call_operand.vmem [shape: f32[2,1,1], index: 6, kind: output, shape index: {3}]   ;;  %s2500_s7 = inlined_call_operand.vmem [shape: f32[2,1,1], index: 7, kind: output, shape index: {4}]  }
   0x1   :  { %s1750_s26 = smov 0  }
   0x2 LB: > { %s30_s27 = sadd.s32 1, %s1698_s25  ;;  %p1476_p0 = scmp.ge.s32.totalorder %s1702_s26, 1  ;;  %s1702_s26 = sphi %s1750_s26, %s18_s26   ;;  %s1698_s25 = sphi %s1748_s25, %s2587_s25   ;;  %s1694_s24 = sphi %s1746_s24, %s2586_s24  }
   0x3   : > { %p32_p1 = scmp.ge.s32.totalorder %s30_s27, 2  ;;  %p265_p2 = scmp.lt.s32.totalorder %s1702_s26, 3 }
   0x5   : > { %s2589_s27 = smov (%p32_p1, %s30_s27), 0  ;;  %p266_p3 = pnand %p1476_p0, %p265_p2 }
   0x6   : > { %p317_p4 = scmp.lt.s32.totalorder (!%p266_p3), %s1694_s24, 1 }
   0x7   : > { %269 = sbr.rel (%p266_p3) target bundleno = 535 (0x217), region = 32 }
   0xc   : > { %v351_v0 = vld [vmem:[%s2494_s1] sm:$0xff]  ;;  %vm2501_vm0 = vcmask 261120   ;;  %v1704_v1 = vmov 0   ;;  %s2591_s24 = smov (!%p317_p4, %s1694_s24), 1  ;;  %v563_v2 = vld [vmem:[%s2495_s2 + $0x10] sm:$0xff]  ;;  %v564_v6 = vld [vmem:[%s2495_s2 + $0x18] sm:$0xff] }
   0xd   : > { %1588 = vmatprep.mubr.msk.f32.mxu0 %vm2501_vm0, %v351_v0  ;;  %1679 = vset.pattern.permute.xlu1 %v1704_v1  ;;  %s1537_s30 = sshll.u32 %s2591_s24, 5  ;;  %v561_v3 = vld [vmem:[%s2495_s2] sm:$0xff]  ;;  %v562_v8 = vld [vmem:[%s2495_s2 + $0x8] sm:$0xff]  ;;  %v353_v13 = vld [vmem:[%s2494_s1 + $0x10] sm:$0xff]  ;;  %vm2503_vm1 = vcmask 523264   ;;  %s1538_s16 = sshll.u32 %s2591_s24, 7 }
   0xe   : > { %1678 = vset.pattern.permute.xlu0 %v1704_v1  ;;  %s324_s10 = scalar_lea.vmem %s2493_s0, %s1537_s30  ;;  %589 = vperm.xlu1 %1679, %v563_v2   ;;  %v566_v10 = vld [vmem:[%s2495_s2 + $0x28] sm:$0xff]  ;;  %v565_v12 = vld [vmem:[%s2495_s2 + $0x20] sm:$0xff]  ;;  %v568_v14 = vld [vmem:[%s2495_s2 + $0x38] sm:$0xff]  ;;  %s1934_s19 = scalar_lea.vmem %s2497_s4, %s1538_s16  ;;  %v1705_v37 = vmov 0.0   ;;  %vm2502_vm2 = vcmask 7168  }
   0xf   : > { %v1780_v4 = vld [vmem:[%s324_s10 + $0x18] sm:$0xff]  ;;  %v1782_v5 = vld [vmem:[%s324_s10 + $0x10] sm:$0xff]  ;;  %579 = vperm.xlu0 %1678, %v561_v3   ;;  %v1789_v7 = vld [vmem:[%s324_s10 + $0x8] sm:$0xff]  ;;  %869 = vst.msk [vmem:[%s1934_s19] sm:$0xff] %vm2501_vm0, %v1705_v37  ;;  %s1987_s22 = scalar_lea.vmem %s2498_s5, %s1538_s16  ;;  %s330_s29 = scalar_lea.vmem %s2496_s3, %s2591_s24 }
  0x10   : > { %1580 = vmatprep.subr.mxu0 %v1780_v4  ;;  %v1796_v9 = vld [vmem:[%s324_s10] sm:$0xff]  ;;  %v352_v11 = vld [vmem:[%s2494_s1 + $0x8] sm:$0xff]  ;;  %v354_v15 = vld [vmem:[%s2494_s1 + $0x18] sm:$0xff]  ;;  %1644 = vmatprep.subr.msk.mxu1 %vm2503_vm1, %v1780_v4  ;;  %870 = vst.msk [vmem:[%s1934_s19 + $0x8] sm:$0xff] %vm2501_vm0, %v1705_v37  ;;  %s2368_s9 = scalar_lea.vmem %s2500_s7, %s2591_s24  ;;  %s2377_s12 = scalar_lea.vmem %s2499_s6, %s2591_s24 }
  0x11   : > { %1581 = vmatpush3.msra.mxu0 %v1780_v4  ;;  %v567_v16 = vld [vmem:[%s2495_s2 + $0x30] sm:$0xff]  ;;  %v355_v17 = vld [vmem:[%s2494_s1 + $0x20] sm:$0xff]  ;;  %v570_v18 = vld [vmem:[%s2495_s2 + $0x48] sm:$0xff]  ;;  %1648 = vmatpush3.xpose.msk.msra.mxu1 %vm2503_vm1, %v1780_v4  ;;  %871 = vst.msk [vmem:[%s1934_s19 + $0x10] sm:$0xff] %vm2501_vm0, %v1705_v37 }
  0x12   : > { %1582 = vmatprep.subr.mxu0 %v1782_v5  ;;  %594 = vperm.xlu1 %1679, %v564_v6   ;;  %v356_v19 = vld [vmem:[%s2494_s1 + $0x28] sm:$0xff]  ;;  %v569_v20 = vld [vmem:[%s2495_s2 + $0x40] sm:$0xff]  ;;  %v357_v21 = vld [vmem:[%s2494_s1 + $0x30] sm:$0xff]  ;;  %872 = vst.msk [vmem:[%s1934_s19 + $0x18] sm:$0xff] %vm2501_vm0, %v1705_v37 }
  0x13   : > { %1583 = vmatpush3.msra.mxu0 %v1782_v5  ;;  %584 = vperm.xlu0 %1678, %v562_v8   ;;  %v572_v22 = vld [vmem:[%s2495_s2 + $0x58] sm:$0xff]  ;;  %v571_v24 = vld [vmem:[%s2495_s2 + $0x50] sm:$0xff]  ;;  %v359_v25 = vld [vmem:[%s2494_s1 + $0x40] sm:$0xff]  ;;  %873 = vst.msk [vmem:[%s1934_s19 + $0x20] sm:$0xff] %vm2501_vm0, %v1705_v37 }
  0x14   : > { %1584 = vmatprep.subr.mxu0 %v1789_v7  ;;  %v358_v23 = vld [vmem:[%s2494_s1 + $0x38] sm:$0xff]  ;;  %v574_v26 = vld [vmem:[%s2495_s2 + $0x68] sm:$0xff]  ;;  %v573_v28 = vld [vmem:[%s2495_s2 + $0x60] sm:$0xff]  ;;  %1645 = vmatprep.subr.msk.mxu1 %vm2503_vm1, %v1782_v5  ;;  %874 = vst.msk [vmem:[%s1934_s19 + $0x28] sm:$0xff] %vm2501_vm0, %v1705_v37 }
  0x15   : > { %1585 = vmatpush3.msra.mxu0 %v1789_v7  ;;  %v360_v27 = vld [vmem:[%s2494_s1 + $0x48] sm:$0xff]  ;;  %v361_v29 = vld [vmem:[%s2494_s1 + $0x50] sm:$0xff]  ;;  %v576_v30 = vld [vmem:[%s2495_s2 + $0x78] sm:$0xff]  ;;  %1649 = vmatpush3.xpose.msk.msra.mxu1 %vm2503_vm1, %v1782_v5  ;;  %875 = vst.msk [vmem:[%s1934_s19 + $0x30] sm:$0xff] %vm2501_vm0, %v1705_v37 }
  0x16   : > { %1586 = vmatprep.subr.mxu0 %v1796_v9  ;;  %604 = vperm.xlu1 %1679, %v566_v10   ;;  %v362_v31 = vld [vmem:[%s2494_s1 + $0x58] sm:$0xff]  ;;  %v575_v32 = vld [vmem:[%s2495_s2 + $0x70] sm:$0xff]  ;;  %v363_v33 = vld [vmem:[%s2494_s1 + $0x60] sm:$0xff]  ;;  %876 = vst.msk [vmem:[%s1934_s19 + $0x38] sm:$0xff] %vm2501_vm0, %v1705_v37 }
  0x17   : > { %1587 = vmatpush3.msra.mxu0 %v1796_v9  ;;  %599 = vperm.xlu0 %1678, %v565_v12   ;;  %v364_v34 = vld [vmem:[%s2494_s1 + $0x68] sm:$0xff]  ;;  %v365_v35 = vld [vmem:[%s2494_s1 + $0x70] sm:$0xff]  ;;  %v366_v36 = vld [vmem:[%s2494_s1 + $0x78] sm:$0xff]  ;;  %877 = vst.msk [vmem:[%s1934_s19 + $0x40] sm:$0xff] %vm2501_vm0, %v1705_v37 }
  0x18   : > { %1589 = vmatmul.mubr.msk.f32.vlgmr.msra.gmra.mxu0 %vm2501_vm0, %v352_v11  ;;  %1612 = vmatprep.subr.msk.mxu0 %vm2503_vm1, %v1780_v4  ;;  %878 = vst.msk [vmem:[%s1934_s19 + $0x48] sm:$0xff] %vm2501_vm0, %v1705_v37  ;;  %879 = vst.msk [vmem:[%s1934_s19 + $0x50] sm:$0xff] %vm2501_vm0, %v1705_v37 }
  0x19   : > { %1591 = vmatprep.mubr.msk.f32.mxu0 %vm2501_vm0, %v353_v13  ;;  %1613 = vmatpush3.xpose.msk.msra.mxu0 %vm2503_vm1, %v1780_v4  ;;  %880 = vst.msk [vmem:[%s1934_s19 + $0x58] sm:$0xff] %vm2501_vm0, %v1705_v37  ;;  %881 = vst.msk [vmem:[%s1934_s19 + $0x60] sm:$0xff] %vm2501_vm0, %v1705_v37 }
  0x1a   : > { %614 = vperm.xlu1 %1679, %v568_v14   ;;  %1614 = vmatprep.subr.msk.mxu0 %vm2503_vm1, %v1782_v5  ;;  %882 = vst.msk [vmem:[%s1934_s19 + $0x68] sm:$0xff] %vm2501_vm0, %v1705_v37  ;;  %883 = vst.msk [vmem:[%s1934_s19 + $0x70] sm:$0xff] %vm2501_vm0, %v1705_v37 }
  0x1b   : > { %609 = vperm.xlu0 %1678, %v567_v16   ;;  %1646 = vmatprep.subr.msk.mxu1 %vm2503_vm1, %v1789_v7  ;;  %884 = vst.msk [vmem:[%s1934_s19 + $0x78] sm:$0xff] %vm2501_vm0, %v1705_v37 }
  0x1c   : > { %1592 = vmatmul.mubr.msk.f32.gmra.mxu0 %vm2501_vm0, %v354_v15  ;;  %1650 = vmatpush3.xpose.msk.msra.mxu1 %vm2503_vm1, %v1789_v7  ;;  %887 = vst.msk [vmem:[%s1987_s22 + $0x8] sm:$0xff] %vm2502_vm2, %v1705_v37  ;;  %886 = vst.msk [vmem:[%s1987_s22] sm:$0xff] %vm2502_vm2, %v1705_v37 }
  0x1d   : > { %1594 = vmatprep.mubr.msk.f32.mxu0 %vm2501_vm0, %v355_v17  ;;  %1615 = vmatpush3.xpose.msk.msra.mxu0 %vm2503_vm1, %v1782_v5  ;;  %888 = vst.msk [vmem:[%s1987_s22 + $0x10] sm:$0xff] %vm2502_vm2, %v1705_v37  ;;  %889 = vst.msk [vmem:[%s1987_s22 + $0x18] sm:$0xff] %vm2502_vm2, %v1705_v37 }
  0x1e   : > { %624 = vperm.xlu1 %1679, %v570_v18   ;;  %1616 = vmatprep.subr.msk.mxu0 %vm2503_vm1, %v1789_v7  ;;  %890 = vst.msk [vmem:[%s1987_s22 + $0x20] sm:$0xff] %vm2502_vm2, %v1705_v37  ;;  %891 = vst.msk [vmem:[%s1987_s22 + $0x28] sm:$0xff] %vm2502_vm2, %v1705_v37 }
  0x1f   : > { %619 = vperm.xlu0 %1678, %v569_v20   ;;  %1647 = vmatprep.subr.msk.mxu1 %vm2503_vm1, %v1796_v9  ;;  %892 = vst.msk [vmem:[%s1987_s22 + $0x30] sm:$0xff] %vm2502_vm2, %v1705_v37  ;;  %893 = vst.msk [vmem:[%s1987_s22 + $0x38] sm:$0xff] %vm2502_vm2, %v1705_v37 }
  0x20   : > { %1595 = vmatmul.mubr.msk.f32.gmra.mxu0 %vm2501_vm0, %v356_v19  ;;  %1651 = vmatpush3.xpose.msk.msra.mxu1 %vm2503_vm1, %v1796_v9  ;;  %894 = vst.msk [vmem:[%s1987_s22 + $0x40] sm:$0xff] %vm2502_vm2, %v1705_v37  ;;  %895 = vst.msk [vmem:[%s1987_s22 + $0x48] sm:$0xff] %vm2502_vm2, %v1705_v37 }
  0x21   : > { %1597 = vmatprep.mubr.msk.f32.mxu0 %vm2501_vm0, %v357_v21  ;;  %1617 = vmatpush3.xpose.msk.msra.mxu0 %vm2503_vm1, %v1789_v7  ;;  %896 = vst.msk [vmem:[%s1987_s22 + $0x50] sm:$0xff] %vm2502_vm2, %v1705_v37  ;;  %897 = vst.msk [vmem:[%s1987_s22 + $0x58] sm:$0xff] %vm2502_vm2, %v1705_v37 }
  0x22   : > { %634 = vperm.xlu1 %1679, %v572_v22   ;;  %1618 = vmatprep.subr.msk.mxu0 %vm2503_vm1, %v1796_v9  ;;  %898 = vst.msk [vmem:[%s1987_s22 + $0x60] sm:$0xff] %vm2502_vm2, %v1705_v37  ;;  %899 = vst.msk [vmem:[%s1987_s22 + $0x68] sm:$0xff] %vm2502_vm2, %v1705_v37 }
  0x23   : > { %629 = vperm.xlu0 %1678, %v571_v24   ;;  %900 = vst.msk [vmem:[%s1987_s22 + $0x70] sm:$0xff] %vm2502_vm2, %v1705_v37  ;;  %901 = vst.msk [vmem:[%s1987_s22 + $0x78] sm:$0xff] %vm2502_vm2, %v1705_v37 }
  0x24   : > { %1598 = vmatmul.mubr.msk.f32.gmra.mxu0 %vm2501_vm0, %v358_v23 }
  0x25   : > { %1600 = vmatprep.mubr.msk.f32.mxu0 %vm2501_vm0, %v359_v25  ;;  %1619 = vmatpush3.xpose.msk.msra.mxu0 %vm2503_vm1, %v1796_v9 }
  0x26   : > { %644 = vperm.xlu1 %1679, %v574_v26  }
  0x27   : > { %639 = vperm.xlu0 %1678, %v573_v28  }
  0x28   : > { %1601 = vmatmul.mubr.msk.f32.gmra.mxu0 %vm2501_vm0, %v360_v27 }
  0x29   : > { %1603 = vmatprep.mubr.msk.f32.mxu0 %vm2501_vm0, %v361_v29 }
  0x2a   : > { %654 = vperm.xlu1 %1679, %v576_v30  }
  0x2b   : > { %649 = vperm.xlu0 %1678, %v575_v32  }
  0x2c   : > { %1604 = vmatmul.mubr.msk.f32.gmra.mxu0 %vm2501_vm0, %v362_v31 }
  0x2d   : > { %1606 = vmatprep.mubr.msk.f32.mxu0 %vm2501_vm0, %v363_v33 }
  0x30   : > { %1607 = vmatmul.mubr.msk.f32.gmra.mxu0 %vm2501_vm0, %v364_v34 }
  0x31   : > { %1609 = vmatprep.mubr.msk.f32.mxu0 %vm2501_vm0, %v365_v35 }
  0x34   : > { %1610 = vmatmul.mubr.msk.f32.gmra.mxu0 %vm2501_vm0, %v366_v36 }
  0x89   : > { %v590_v38 = vpop.permute.xlu1 %589 }
  0x8a   : > { %v580_v39 = vpop.permute.xlu0 %579 }
  0x8d   : > { %v595_v40 = vpop.permute.xlu1 %594 }
  0x8e   : > { %v585_v41 = vpop.permute.xlu0 %584 }
  0x91   : > { %v605_v42 = vpop.permute.xlu1 %604 }
  0x92   : > { %v600_v43 = vpop.permute.xlu0 %599 }
  0x95   : > { %v615_v46 = vpop.permute.xlu1 %614 }
  0x96   : > { %v610_v48 = vpop.permute.xlu0 %609 }
  0x99   : > { %v625_v51 = vpop.permute.xlu1 %624 }
  0x9a   : > { %v620_v53 = vpop.permute.xlu0 %619 }
  0x9d   : > { %v635_v56 = vpop.permute.xlu1 %634 }
  0x9e   : > { %v630_v58 = vpop.permute.xlu0 %629 }
  0xa1   : > { %v645_v62 = vpop.permute.xlu1 %644 }
  0xa2   : > { %v640_v10 = vpop.permute.xlu0 %639 }
  0xa5   : > { %v655_v27 = vpop.permute.xlu1 %654 }
  0xd8   : > { %v1590_v44 = vpop.f32.mrf.mxu0 }
  0xd9   : > { %v2039_v63 = vsub.f32 %v1590_v44, %v585_v41 }
  0xda   : > { %v482_v45 = vpop.f32.mrf.mxu0 }
  0xdb   : > { %v2041_v0 = vsub.f32 %v482_v45, %v580_v39  ;;  %v675_v18 = vsel %vm2503_vm1, %v2039_v63, -inf }
  0xdc   : > { %v1593_v47 = vpop.f32.mrf.mxu0 }
  0xdd   : > { %v2051_v11 = vsub.f32 %v1593_v47, %v595_v40  ;;  %v674_v19 = vsel %vm2503_vm1, %v2041_v0, -inf }
  0xde   : > { %v492_v49 = vpop.f32.mrf.mxu0 }
  0xdf   : > { %v2053_v12 = vsub.f32 %v492_v49, %v590_v38  ;;  %v677_v28 = vsel %vm2503_vm1, %v2051_v11, -inf  ;;  %v650_v38 = vpop.permute.xlu0 %649 }
  0xe0   : > { %v1596_v50 = vpop.f32.mrf.mxu0 }
  0xe1   : > { %v2043_v1 = vsub.f32 %v1596_v50, %v605_v42  ;;  %v676_v29 = vsel %vm2503_vm1, %v2053_v12, -inf }
  0xe2   : > { %v502_v52 = vpop.f32.mrf.mxu0 }
  0xe3   : > { %v2037_v61 = vsub.f32 %v502_v52, %v600_v43  ;;  %v680_v20 = vsel %vm2503_vm1, %v2043_v1, -inf }
  0xe4   : > { %v1599_v54 = vpop.f32.mrf.mxu0  ;;  %v681_v39 = vmax.f32 %v675_v18, %v680_v20 }
  0xe5   : > { %v2045_v2 = vsub.f32 %v1599_v54, %v615_v46  ;;  %v678_v15 = vsel %vm2503_vm1, %v2037_v61, -inf }
  0xe6   : > { %v512_v55 = vpop.f32.mrf.mxu0  ;;  %v679_v30 = vmax.f32 %v674_v19, %v678_v15 }
  0xe7   : > { %v2047_v6 = vsub.f32 %v512_v55, %v610_v48  ;;  %v684_v21 = vsel %vm2503_vm1, %v2045_v2, -inf }
  0xe8   : > { %v1602_v57 = vpop.f32.mrf.mxu0  ;;  %v685_v40 = vmax.f32 %v677_v28, %v684_v21 }
  0xe9   : > { %v2055_v13 = vsub.f32 %v1602_v57, %v625_v51  ;;  %v682_v23 = vsel %vm2503_vm1, %v2047_v6, -inf }
  0xea   : > { %v522_v59 = vpop.f32.mrf.mxu0  ;;  %v683_v41 = vmax.f32 %v676_v29, %v682_v23 }
  0xeb   : > { %v2049_v8 = vsub.f32 %v522_v59, %v620_v53  ;;  %v688_v31 = vsel %vm2503_vm1, %v2055_v13, -inf }
  0xec   : > { %v1605_v60 = vpop.f32.mrf.mxu0  ;;  %v689_v47 = vmax.f32 %v681_v39, %v688_v31 }
  0xed   : > { %v2059_v16 = vsub.f32 %v1605_v60, %v635_v56  ;;  %v686_v24 = vsel %vm2503_vm1, %v2049_v8, -inf }
  0xee   : > { %v532_v3 = vpop.f32.mrf.mxu0  ;;  %v687_v42 = vmax.f32 %v679_v30, %v686_v24 }
  0xef   : > { %v2061_v17 = vsub.f32 %v532_v3, %v630_v58  ;;  %v692_v33 = vsel %vm2503_vm1, %v2059_v16, -inf  ;;  %v711_v58 = vlaneseq }
  0xf0   : > { %v1608_v14 = vpop.f32.mrf.mxu0  ;;  %v693_v48 = vmax.f32 %v685_v40, %v692_v33 }
  0xf1   : > { %v2075_v25 = vsub.f32 %v1608_v14, %v645_v62  ;;  %v690_v34 = vsel %vm2503_vm1, %v2061_v17, -inf  ;;  %v2101_v62 = vshrl.u32 %v711_v58, 7 }
  0xf2   : > { %v542_v22 = vpop.f32.mrf.mxu0  ;;  %v691_v49 = vmax.f32 %v683_v41, %v690_v34 }
  0xf3   : > { %v2077_v26 = vsub.f32 %v542_v22, %v640_v10  ;;  %v696_v44 = vsel %vm2503_vm1, %v2075_v25, -inf  ;;  %v2104_v14 = vadd.s32 8, %v2101_v62  ;;  %v2107_v18 = vadd.s32 16, %v2101_v62 }
  0xf4   : > { %v1611_v32 = vpop.f32.mrf.mxu0  ;;  %v697_v52 = vmax.f32 %v689_v47, %v696_v44  ;;  %v2110_v19 = vadd.s32 24, %v2101_v62  ;;  %v2113_v20 = vadd.s32 32, %v2101_v62  ;;  %v2116_v21 = vadd.s32 40, %v2101_v62 }
  0xf5   : > { %v694_v35 = vsel %vm2503_vm1, %v2077_v26, -inf  ;;  %v2091_v36 = vsub.f32 %v1611_v32, %v655_v27  ;;  %v2119_v22 = vadd.s32 48, %v2101_v62  ;;  %v2122_v23 = vadd.s32 56, %v2101_v62 }
  0xf6   : > { %v552_v43 = vpop.f32.mrf.mxu0  ;;  %v695_v50 = vmax.f32 %v687_v42, %v694_v35  ;;  %v2125_v24 = vadd.s32 64, %v2101_v62  ;;  %v2130_v28 = vadd.s32 72, %v2101_v62  ;;  %v2133_v29 = vadd.s32 80, %v2101_v62 }
  0xf7   : > { %v700_v45 = vsel %vm2503_vm1, %v2091_v36, -inf  ;;  %v2097_v46 = vsub.f32 %v552_v43, %v650_v38  ;;  %v2136_v30 = vadd.s32 88, %v2101_v62  ;;  %v2139_v31 = vadd.s32 96, %v2101_v62 }
  0xf8   : > { %v701_v53 = vmax.f32 %v693_v48, %v700_v45  ;;  %v702_v55 = vmax.f32 %v695_v50, %v697_v52  ;;  %v2142_v32 = vadd.s32 104, %v2101_v62  ;;  %v2145_v33 = vadd.s32 112, %v2101_v62 }
  0xf9   : > { %v698_v51 = vsel %vm2503_vm1, %v2097_v46, -inf  ;;  %v2148_v34 = vadd.s32 120, %v2101_v62 }
  0xfa   : > { %v699_v54 = vmax.f32 %v691_v49, %v698_v51 }
  0xfc   : > { %v703_v56 = vmax.f32 %v699_v54, %v701_v53 }
  0xfe   : > { %v704_v57 = vmax.f32 %v702_v55, %v703_v56 }
 0x100   : > { %v705_v59 = vrot.slane %v704_v57, 4 }
 0x102   : > { %v706_v60 = vmax.f32 %v704_v57, %v705_v59 }
 0x104   : > { %v707_v3 = vrot.slane %v706_v60, 2 }
 0x106   : > { %v708_v10 = vmax.f32 %v706_v60, %v707_v3 }
 0x108   : > { %v709_v15 = vrot.slane %v708_v10, 1 }
 0x10a   : > { %v2127_v27 = vmax.f32 %v708_v10, %v709_v15 }
 0x10c   : > { %vm728_vm3 = vcmp.eq.f32.partialorder %v2041_v0, %v2127_v27  ;;  %vm729_vm4 = vcmp.eq.f32.partialorder %v2039_v63, %v2127_v27  ;;  %vm730_vm5 = vcmp.eq.f32.partialorder %v2053_v12, %v2127_v27  ;;  %vm731_vm6 = vcmp.eq.f32.partialorder %v2051_v11, %v2127_v27 }
 0x10d   : > { %vm732_vm7 = vcmp.eq.f32.partialorder %v2037_v61, %v2127_v27  ;;  %vm733_vm8 = vcmp.eq.f32.partialorder %v2043_v1, %v2127_v27  ;;  %vm734_vm9 = vcmp.eq.f32.partialorder %v2047_v6, %v2127_v27  ;;  %vm735_vm10 = vcmp.eq.f32.partialorder %v2045_v2, %v2127_v27 }
 0x10e   : > { %vm736_vm11 = vcmp.eq.f32.partialorder %v2049_v8, %v2127_v27  ;;  %vm737_vm12 = vcmp.eq.f32.partialorder %v2055_v13, %v2127_v27  ;;  %vm738_vm13 = vcmp.eq.f32.partialorder %v2061_v17, %v2127_v27  ;;  %vm739_vm14 = vcmp.eq.f32.partialorder %v2059_v16, %v2127_v27 }
 0x10f   : > { %vm740_vm15 = vcmp.eq.f32.partialorder %v2077_v26, %v2127_v27  ;;  %vm741_vm0 = vcmp.eq.f32.partialorder %v2075_v25, %v2127_v27  ;;  %vm742_vm2 = vcmp.eq.f32.partialorder %v2097_v46, %v2127_v27  ;;  %vm743_vm1 = vcmp.eq.f32.partialorder %v2091_v36, %v2127_v27 }
 0x110   : > { %v744_v35 = vsel %vm728_vm3, %v2101_v62, 128  ;;  %v745_v38 = vsel %vm729_vm4, %v2104_v14, 128  ;;  %v746_v39 = vsel %vm730_vm5, %v2107_v18, 128  ;;  %v747_v40 = vsel %vm731_vm6, %v2110_v19, 128 }
 0x111   : > { %v748_v0 = vsel %vm732_vm7, %v2113_v20, 128  ;;  %v749_v63 = vsel %vm733_vm8, %v2116_v21, 128  ;;  %v750_v12 = vsel %vm734_vm9, %v2119_v22, 128  ;;  %v751_v11 = vsel %vm735_vm10, %v2122_v23, 128 }
 0x112   : > { %v752_v61 = vsel %vm736_vm11, %v2125_v24, 128  ;;  %v753_v1 = vsel %vm737_vm12, %v2130_v28, 128  ;;  %v754_v6 = vsel %vm738_vm13, %v2133_v29, 128  ;;  %v755_v2 = vsel %vm739_vm14, %v2136_v30, 128 }
 0x113   : > { %v756_v8 = vsel %vm740_vm15, %v2139_v31, 128  ;;  %v757_v13 = vsel %vm741_vm0, %v2142_v32, 128  ;;  %v758_v17 = vsel %vm742_vm2, %v2145_v33, 128  ;;  %v759_v16 = vsel %vm743_vm1, %v2148_v34, 128 }
 0x114   : > { %vm2504_vm3 = vcmask 523264  }
 0x115   : > { %v760_v41 = vsel %vm2504_vm3, %v744_v35, 2147483647  ;;  %vm2505_vm4 = vmmov %vm2504_vm3 }
 0x116   : > { %v761_v26 = vsel %vm2505_vm4, %v745_v38, 2147483647  ;;  %vm2506_vm5 = vmmov %vm2504_vm3 }
 0x117   : > { %v762_v42 = vsel %vm2506_vm5, %v746_v39, 2147483647  ;;  %vm2507_vm6 = vmmov %vm2504_vm3 }
 0x118   : > { %v763_v43 = vsel %vm2507_vm6, %v747_v40, 2147483647  ;;  %vm2508_vm7 = vmmov %vm2504_vm3  ;;  %v1256_v40 = vmul.f32 %v1796_v9, %v1796_v9  ;;  %v1259_v9 = vmul.f32 %v1780_v4, %v1780_v4 }
 0x119   : > { %v764_v25 = vsel %vm2508_vm7, %v748_v0, 2147483647  ;;  %vm2509_vm0 = vmmov %vm2504_vm3  ;;  %v1257_v0 = vmul.f32 %v1789_v7, %v1789_v7 }
 0x11a   : > { %v767_v44 = vsel %vm2509_vm0, %v749_v63, 2147483647  ;;  %vm765_vm8 = vcmp.lt.s32.totalorder %v760_v41, %v764_v25  ;;  %vm2510_vm2 = vmmov %vm2509_vm0  ;;  %v791_v59 = vsel %vm2509_vm0, %v757_v13, 2147483647 }
 0x11b   : > { %vm768_vm9 = vcmp.lt.s32.totalorder %v761_v26, %v767_v44  ;;  %v770_v45 = vsel %vm2510_vm2, %v750_v12, 2147483647  ;;  %vm2511_vm10 = vmmov %vm2509_vm0  ;;  %v766_v36 = vsel %vm765_vm8, %v760_v41, %v764_v25 }
 0x11c   : > { %v773_v46 = vsel %vm2511_vm10, %v751_v11, 2147483647  ;;  %v769_v47 = vsel %vm768_vm9, %v761_v26, %v767_v44  ;;  %vm771_vm1 = vcmp.lt.s32.totalorder %v762_v42, %v770_v45  ;;  %vm2512_vm12 = vmmov %vm2509_vm0 }
 0x11d   : > { %vm774_vm11 = vcmp.lt.s32.totalorder %v763_v43, %v773_v46  ;;  %v772_v48 = vsel %vm771_vm1, %v762_v42, %v770_v45  ;;  %v776_v50 = vsel %vm2512_vm12, %v752_v61, 2147483647  ;;  %vm2513_vm13 = vmmov %vm2509_vm0  ;;  %v1258_v61 = vmul.f32 %v1782_v5, %v1782_v5 }
 0x11e   : > { %v775_v49 = vsel %vm774_vm11, %v763_v43, %v773_v46  ;;  %v779_v51 = vsel %vm2513_vm13, %v753_v1, 2147483647  ;;  %vm777_vm14 = vcmp.lt.s32.totalorder %v766_v36, %v776_v50  ;;  %vm2514_vm3 = vmmov %vm2509_vm0 }
 0x11f   : > { %vm780_vm15 = vcmp.lt.s32.totalorder %v769_v47, %v779_v51  ;;  %v782_v52 = vsel %vm2514_vm3, %v754_v6, 2147483647  ;;  %vm2515_vm4 = vmmov %vm2509_vm0  ;;  %v778_v54 = vsel %vm777_vm14, %v766_v36, %v776_v50 }
 0x120   : > { %v785_v53 = vsel %vm2515_vm4, %v755_v2, 2147483647  ;;  %v781_v55 = vsel %vm780_vm15, %v769_v47, %v779_v51  ;;  %vm783_vm5 = vcmp.lt.s32.totalorder %v772_v48, %v782_v52  ;;  %vm2516_vm7 = vmmov %vm2509_vm0 }
 0x121   : > { %vm786_vm6 = vcmp.lt.s32.totalorder %v775_v49, %v785_v53  ;;  %v784_v56 = vsel %vm783_vm5, %v772_v48, %v782_v52  ;;  %v788_v58 = vsel %vm2516_vm7, %v756_v8, 2147483647  ;;  %vm792_vm9 = vcmp.lt.s32.totalorder %v781_v55, %v791_v59  ;;  %vm2517_vm2 = vmmov %vm2509_vm0 }
 0x122   : > { %v787_v57 = vsel %vm786_vm6, %v775_v49, %v785_v53  ;;  %vm789_vm8 = vcmp.lt.s32.totalorder %v778_v54, %v788_v58  ;;  %v794_v60 = vsel %vm2517_vm2, %v758_v17, 2147483647  ;;  %vm2518_vm10 = vmmov %vm2509_vm0  ;;  %v793_v15 = vsel %vm792_vm9, %v781_v55, %v791_v59 }
 0x123   : > { %v797_v3 = vsel %vm2518_vm10, %v759_v16, 2147483647  ;;  %v790_v10 = vsel %vm789_vm8, %v778_v54, %v788_v58  ;;  %vm795_vm1 = vcmp.lt.s32.totalorder %v784_v56, %v794_v60  ;;  %vm2519_vm15 = vmmov %vm2509_vm0 }
 0x124   : > { %vm798_vm11 = vcmp.lt.s32.totalorder %v787_v57, %v797_v3  ;;  %v796_v35 = vsel %vm795_vm1, %v784_v56, %v794_v60  ;;  %vm800_vm12 = vcmp.lt.s32.totalorder %v790_v10, %v793_v15  ;;  %v1260_v1 = vsel %vm2519_vm15, %v1256_v40, 0.0  ;;  %vm2520_vm3 = vmmov %vm2509_vm0 }
 0x125   : > { %v799_v38 = vsel %vm798_vm11, %v787_v57, %v797_v3  ;;  %v801_v39 = vsel %vm800_vm12, %v790_v10, %v793_v15  ;;  %v1261_v6 = vsel %vm2520_vm3, %v1257_v0, 0.0  ;;  %vm2521_vm5 = vmmov %vm2509_vm0 }
 0x126   : > { %vm802_vm13 = vcmp.lt.s32.totalorder %v796_v35, %v799_v38  ;;  %v1262_v8 = vadd.f32 %v1261_v6, %v1260_v1  ;;  %v1263_v7 = vsel %vm2521_vm5, %v1258_v61, 0.0  ;;  %vm2522_vm7 = vmmov %vm2509_vm0  ;;  %vm815_vm0 = vcmask 516096   ;;  %v1164_v6 = vld [vmem:[%s1987_s22 + $0x30] sm:$0xff] }
 0x127   : > { %v803_v63 = vsel %vm802_vm13, %v796_v35, %v799_v38  ;;  %v1265_v26 = vsel %vm2522_vm7, %v1259_v9, 0.0  ;;  %vm2523_vm11 = vmmov %vm2520_vm3  ;;  %v1158_v35 = vld [vmem:[%s1987_s22] sm:$0xff] }
 0x128   : > { %vm804_vm14 = vcmp.lt.s32.totalorder %v801_v39, %v803_v63  ;;  %v1264_v16 = vadd.f32 %v1263_v7, %v1262_v8  ;;  %vm2524_vm12 = vmmov %vm2520_vm3 }
 0x129   : > { %v805_v12 = vsel %vm804_vm14, %v801_v39, %v803_v63  ;;  %vm2525_vm13 = vmmov %vm2520_vm3  ;;  %v1162_v63 = vld [vmem:[%s1987_s22 + $0x20] sm:$0xff] }
 0x12a   : > { %v806_v11 = vrot.slane %v805_v12, 4  ;;  %v1266_v42 = vadd.f32 %v1265_v26, %v1264_v16  ;;  %vm2526_vm14 = vmmov %vm2520_vm3  ;;  %v1163_v16 = vld [vmem:[%s1987_s22 + $0x28] sm:$0xff] }
 0x12b   : > { %vm2527_vm5 = vmmov %vm2520_vm3 }
 0x12c   : > { %vm807_vm4 = vcmp.lt.s32.totalorder %v805_v12, %v806_v11  ;;  %vm2528_vm7 = vmmov %vm2520_vm3 }
 0x12d   : > { %v808_v2 = vsel %vm807_vm4, %v805_v12, %v806_v11  ;;  %v1160_v12 = vld [vmem:[%s1987_s22 + $0x10] sm:$0xff] }
 0x12e   : > { %v809_v13 = vrot.slane %v808_v2, 2 }
 0x130   : > { %vm810_vm6 = vcmp.lt.s32.totalorder %v808_v2, %v809_v13 }
 0x131   : > { %v811_v17 = vsel %vm810_vm6, %v808_v2, %v809_v13  ;;  %v1161_v2 = vld [vmem:[%s1987_s22 + $0x18] sm:$0xff] }
 0x132   : > { %v812_v41 = vrot.slane %v811_v17, 1 }
 0x134   : > { %vm813_vm8 = vcmp.lt.s32.totalorder %v811_v17, %v812_v41 }
 0x135   : > { %v2278_v5 = vsel %vm813_vm8, %v811_v17, %v812_v41  ;;  %v1166_v17 = vld [vmem:[%s1987_s22 + $0x40] sm:$0xff] }
 0x136   : > { %816 = vst.msk [vmem:[%s330_s29] sm:$0x1] %vm815_vm0, %v2278_v5  ;;  %vm817_vm9 = vcmp.eq.s32.totalorder %v2101_v62, %v2278_v5  ;;  %vm819_vm2 = vcmp.eq.s32.totalorder %v2107_v18, %v2278_v5  ;;  %vm820_vm10 = vcmp.eq.s32.totalorder %v2110_v19, %v2278_v5  ;;  %vm818_vm1 = vcmp.eq.s32.totalorder %v2104_v14, %v2278_v5  ;;  %vm2529_vm0 = vmmov %vm2520_vm3 }
 0x137   : > { %v1499_v4 = vsel %vm817_vm9, 1.0, %v1705_v37  ;;  %v1501_v43 = vsel %vm819_vm2, 1.0, %v1705_v37  ;;  %v1502_v25 = vsel %vm820_vm10, 1.0, %v1705_v37  ;;  %v1500_v44 = vsel %vm818_vm1, 1.0, %v1705_v37  ;;  %vm2530_vm8 = vmmov %vm2529_vm0 }
 0x138   : > { %1620 = vmatprep.mubr.msk.f32.mxu0 %vm2523_vm11, %v1499_v4  ;;  %1623 = vmatprep.mubr.msk.f32.mxu1 %vm2524_vm12, %v1501_v43  ;;  %v1177_v62 = vsel %vm2525_vm13, %v1500_v44, 0.0  ;;  %v1174_v18 = vsel %vm2526_vm14, %v1499_v4, 0.0  ;;  %vm821_vm15 = vcmp.eq.s32.totalorder %v2113_v20, %v2278_v5  ;;  %vm822_vm4 = vcmp.eq.s32.totalorder %v2116_v21, %v2278_v5  ;;  %vm2531_vm9 = vmmov %vm2529_vm0  ;;  %v1168_v4 = vld [vmem:[%s1987_s22 + $0x50] sm:$0xff] }
 0x139   : > { %1624 = vmatmul.mubr.msk.f32.vlgmr.msra.gmra.mxu1 %vm2520_vm3, %v1502_v25  ;;  %1178 = vadd.xlane.f32.xlu1 %v1177_v62  ;;  %v1503_v14 = vsel %vm821_vm15, 1.0, %v1705_v37  ;;  %vm823_vm6 = vcmp.eq.s32.totalorder %v2119_v22, %v2278_v5  ;;  %v1267_v19 = vrot.slane %v1266_v42, 4  ;;  %v1504_v45 = vsel %vm822_vm4, 1.0, %v1705_v37  ;;  %vm2532_vm10 = vmmov %vm2529_vm0 }
 0x13a   : > { %1175 = vadd.xlane.f32.xlu0 %v1174_v18  ;;  %1621 = vmatmul.mubr.msk.f32.vlgmr.msra.gmra.mxu0 %vm2527_vm5, %v1500_v44  ;;  %v1186_v20 = vsel %vm2529_vm0, %v1503_v14, 0.0  ;;  %v1180_v46 = vsel %vm2531_vm9, %v1501_v43, 0.0  ;;  %v1505_v21 = vsel %vm823_vm6, 1.0, %v1705_v37  ;;  %vm824_vm2 = vcmp.eq.s32.totalorder %v2122_v23, %v2278_v5  ;;  %vm2533_vm11 = vmmov %vm2529_vm0  ;;  %v1165_v43 = vld [vmem:[%s1987_s22 + $0x38] sm:$0xff] }
 0x13b   : > { %1626 = vmatprep.mubr.msk.f32.mxu1 %vm2528_vm7, %v1503_v14  ;;  %vm825_vm1 = vcmp.eq.s32.totalorder %v2125_v24, %v2278_v5  ;;  %v1268_v22 = vadd.f32 %v1267_v19, %v1266_v42  ;;  %v1506_v36 = vsel %vm824_vm2, 1.0, %v1705_v37  ;;  %v1192_v47 = vsel %vm2533_vm11, %v1505_v21, 0.0  ;;  %vm2534_vm12 = vmmov %vm2529_vm0  ;;  %v1170_v14 = vld [vmem:[%s1987_s22 + $0x60] sm:$0xff]  ;;  %v1167_v19 = vld [vmem:[%s1987_s22 + $0x48] sm:$0xff] }
 0x13c   : > { %vm2535_vm13 = vmmov %vm2529_vm0  ;;  %v1507_v49 = vsel %vm825_vm1, 1.0, %v1705_v37  ;;  %vm826_vm14 = vcmp.eq.s32.totalorder %v2130_v28, %v2278_v5  ;;  %vm827_vm3 = vcmp.eq.s32.totalorder %v2133_v29, %v2278_v5  ;;  %vm828_vm7 = vcmp.eq.s32.totalorder %v2136_v30, %v2278_v5 }
 0x13d   : > { %1627 = vmatmul.mubr.msk.f32.gmra.mxu1 %vm2530_vm8, %v1504_v45  ;;  %1187 = vadd.xlane.f32.xlu1 %v1186_v20  ;;  %v1183_v48 = vsel %vm2535_vm13, %v1502_v25, 0.0  ;;  %vm2536_vm15 = vmmov %vm2529_vm0  ;;  %v1269_v23 = vrot.slane %v1268_v22, 2  ;;  %v1508_v24 = vsel %vm826_vm14, 1.0, %v1705_v37  ;;  %v1509_v52 = vsel %vm827_vm3, 1.0, %v1705_v37 }
 0x13e   : > { %1181 = vadd.xlane.f32.xlu0 %v1180_v46  ;;  %1629 = vmatprep.mubr.msk.f32.mxu1 %vm2532_vm10, %v1505_v21  ;;  %vm2537_vm4 = vmmov %vm2529_vm0  ;;  %vm829_vm8 = vcmp.eq.s32.totalorder %v2139_v31, %v2278_v5  ;;  %v1510_v29 = vsel %vm828_vm7, 1.0, %v1705_v37  ;;  %vm830_vm1 = vcmp.eq.s32.totalorder %v2142_v32, %v2278_v5  ;;  %vm832_vm3 = vcmp.eq.s32.totalorder %v2148_v34, %v2278_v5 }
 0x13f   : > { %v1198_v50 = vsel %vm2537_vm4, %v1507_v49, 0.0  ;;  %vm2538_vm5 = vmmov %vm2529_vm0  ;;  %v1270_v28 = vadd.f32 %v1269_v23, %v1268_v22  ;;  %v1511_v55 = vsel %vm829_vm8, 1.0, %v1705_v37  ;;  %v1512_v31 = vsel %vm830_vm1, 1.0, %v1705_v37  ;;  %v1172_v22 = vld [vmem:[%s1987_s22 + $0x70] sm:$0xff] }
 0x140   : > { %vm2539_vm6 = vmmov %vm2529_vm0  ;;  %vm2554_vm1 = vcmask 7168  }
 0x141   : > { %1630 = vmatmul.mubr.msk.f32.gmra.mxu1 %vm2534_vm12, %v1506_v36  ;;  %1193 = vadd.xlane.f32.xlu1 %v1192_v47  ;;  %v1189_v51 = vsel %vm2539_vm6, %v1504_v45, 0.0  ;;  %vm2540_vm9 = vmmov %vm2529_vm0  ;;  %vm831_vm12 = vcmp.eq.s32.totalorder %v2145_v33, %v2278_v5  ;;  %v1271_v30 = vrot.slane %v1270_v28, 1  ;;  %v1514_v33 = vsel %vm832_vm3, 1.0, %v1705_v37 }
 0x142   : > { %1184 = vadd.xlane.f32.xlu0 %v1183_v48  ;;  %1632 = vmatprep.mubr.msk.f32.mxu1 %vm2536_vm15, %v1507_v49  ;;  %v1204_v53 = vsel %vm2540_vm9, %v1509_v52, 0.0  ;;  %vm2541_vm2 = vmmov %vm2529_vm0  ;;  %v1513_v58 = vsel %vm831_vm12, 1.0, %v1705_v37 }
 0x143   : > { %vm2542_vm10 = vmmov %vm2529_vm0  ;;  %v1272_v32 = vadd.f32 %v1271_v30, %v1270_v28 }
 0x144   : > { %v1195_v54 = vsel %vm2542_vm10, %v1506_v36, 0.0  ;;  %vm2543_vm11 = vmmov %vm2529_vm0  ;;  %vm902_vm10 = vcmask 0   ;;  %v1169_v36 = vld [vmem:[%s1987_s22 + $0x58] sm:$0xff] }
 0x145   : > { %1633 = vmatmul.mubr.msk.f32.gmra.mxu1 %vm2538_vm5, %v1508_v24  ;;  %1199 = vadd.xlane.f32.xlu1 %v1198_v50  ;;  %vm2544_vm13 = vmmov %vm2529_vm0  ;;  %v1273_v34 = vsel %vm2529_vm0, %v1272_v32, 0.0  ;;  %904 = vst.msk [vmem:[%s2368_s9] sm:$0x1] %vm902_vm10, %v1705_v37  ;;  %v1171_v50 = vld [vmem:[%s1987_s22 + $0x68] sm:$0xff] }
 0x146   : > { %1190 = vadd.xlane.f32.xlu0 %v1189_v51  ;;  %1635 = vmatprep.mubr.msk.f32.mxu1 %vm2529_vm0, %v1509_v52  ;;  %v1210_v56 = vsel %vm2544_vm13, %v1511_v55, 0.0  ;;  %vm2545_vm14 = vmmov %vm2529_vm0  ;;  %903 = vst.msk [vmem:[%s2377_s12] sm:$0x1] %vm902_vm10, %v1705_v37 }
 0x147   : > { %vm2546_vm15 = vmmov %vm2529_vm0 }
 0x148   : > { %v1201_v57 = vsel %vm2546_vm15, %v1508_v24, 0.0  ;;  %vm2547_vm4 = vmmov %vm2529_vm0 }
 0x149   : > { %1636 = vmatmul.mubr.msk.f32.gmra.mxu1 %vm2541_vm2, %v1510_v29  ;;  %1205 = vadd.xlane.f32.xlu1 %v1204_v53  ;;  %vm2548_vm5 = vmmov %vm2529_vm0  ;;  %v1173_v53 = vld [vmem:[%s1987_s22 + $0x78] sm:$0xff] }
 0x14a   : > { %1196 = vadd.xlane.f32.xlu0 %v1195_v54  ;;  %1638 = vmatprep.mubr.msk.f32.mxu1 %vm2543_vm11, %v1511_v55  ;;  %v1216_v59 = vsel %vm2548_vm5, %v1513_v58, 0.0  ;;  %vm2549_vm6 = vmmov %vm2529_vm0 }
 0x14b   : > { %vm2550_vm7 = vmmov %vm2529_vm0 }
 0x14c   : > { %v1207_v60 = vsel %vm2550_vm7, %v1510_v29, 0.0  ;;  %vm2551_vm8 = vmmov %vm2529_vm0  ;;  %v1279_v30 = vld [vmem:[%s2368_s9] sm:$0x1] }
 0x14d   : > { %1639 = vmatmul.mubr.msk.f32.gmra.mxu1 %vm2545_vm14, %v1512_v31  ;;  %1211 = vadd.xlane.f32.xlu1 %v1210_v56  ;;  %v1213_v3 = vsel %vm2551_vm8, %v1512_v31, 0.0  ;;  %vm2552_vm9 = vmmov %vm2529_vm0  ;;  %v1255_v24 = vld [vmem:[%s2377_s12] sm:$0x1] }
 0x14e   : > { %1202 = vadd.xlane.f32.xlu0 %v1201_v57  ;;  %1641 = vmatprep.mubr.msk.f32.mxu1 %vm2547_vm4, %v1513_v58  ;;  %v1219_v10 = vsel %vm2552_vm9, %v1514_v33, 0.0  ;;  %vm2553_vm2 = vmmov %vm2529_vm0  ;;  %v908_v57 = vld [vmem:[%s1934_s19 + $0x18] sm:$0xff]  ;;  %v906_v58 = vld [vmem:[%s1934_s19 + $0x8] sm:$0xff] }
 0x14f   : > { %v1280_v15 = vsel %vm2553_vm2, %v2127_v27, 0.0  ;;  %v1159_v27 = vld [vmem:[%s1987_s22 + $0x8] sm:$0xff]  ;;  %vm2555_vm11 = vmmov %vm2554_vm1 }
 0x150   : > { %vm2556_vm12 = vmmov %vm2554_vm1 }
 0x151   : > { %1642 = vmatmul.mubr.msk.f32.gmra.mxu1 %vm2549_vm6, %v1514_v33  ;;  %1217 = vadd.xlane.f32.xlu1 %v1216_v59  ;;  %vm2557_vm13 = vmmov %vm2554_vm1  ;;  %v907_v33 = vld [vmem:[%s1934_s19 + $0x10] sm:$0xff] }
 0x152   : > { %1208 = vadd.xlane.f32.xlu0 %v1207_v60  ;;  %vm2558_vm14 = vmmov %vm2554_vm1 }
 0x153   : > { %vm2559_vm15 = vmmov %vm2554_vm1 }
 0x154   : > { %vm2560_vm3 = vmmov %vm2554_vm1 }
 0x155   : > { %1274 = vadd.xlane.f32.xlu1 %v1273_v34  ;;  %vm2561_vm4 = vmmov %vm2554_vm1  ;;  %v905_v34 = vld [vmem:[%s1934_s19] sm:$0xff] }
 0x156   : > { %1214 = vadd.xlane.f32.xlu0 %v1213_v3  ;;  %vm2562_vm5 = vmmov %vm2554_vm1 }
 0x157   : > { %vm2563_vm6 = vmmov %vm2554_vm1 }
 0x158   : > { %vm2564_vm7 = vmmov %vm2554_vm1 }
 0x159   : > { %vm2565_vm0 = vmmov %vm2554_vm1 }
 0x15a   : > { %1220 = vadd.xlane.f32.xlu0 %v1219_v10  ;;  %vm2566_vm8 = vmmov %vm2565_vm0 }
 0x15b   : > { %vm2567_vm9 = vmmov %vm2565_vm0 }
 0x15c   : > { %vm2568_vm2 = vmmov %vm2565_vm0 }
 0x15e   : > { %1281 = vadd.xlane.f32.xlu0 %v1280_v15  ;;  %v910_v15 = vld [vmem:[%s1934_s19 + $0x28] sm:$0xff] }
 0x1c2   : > { %v1179_v38 = vpop.xlane.xlu1 %1178 }
 0x1c3   : > { %v1223_v39 = vadd.f32 %v1179_v38, %v1159_v27  ;;  %v1176_v40 = vpop.xlane.xlu0 %1175 }
 0x1c4   : > { %v1222_v0 = vadd.f32 %v1176_v40, %v1158_v35  ;;  %v909_v40 = vld [vmem:[%s1934_s19 + $0x20] sm:$0xff] }
 0x1c5   : > { %1240 = vst.msk [vmem:[%s1987_s22 + $0x8] sm:$0xff] %vm2554_vm1, %v1223_v39  ;;  %vm2569_vm1 = vmmov %vm2565_vm0 }
 0x1c6   : > { %1239 = vst.msk [vmem:[%s1987_s22] sm:$0xff] %vm2555_vm11, %v1222_v0  ;;  %v1188_v37 = vpop.xlane.xlu1 %1187  ;;  %vm2570_vm11 = vcmask 261120  }
 0x1c7   : > { %v1226_v11 = vadd.f32 %v1188_v37, %v1162_v63  ;;  %v1182_v61 = vpop.xlane.xlu0 %1181 }
 0x1c8   : > { %v1224_v1 = vadd.f32 %v1182_v61, %v1160_v12  ;;  %v912_v12 = vld [vmem:[%s1934_s19 + $0x38] sm:$0xff]  ;;  %v911_v61 = vld [vmem:[%s1934_s19 + $0x30] sm:$0xff] }
 0x1c9   : > { %1243 = vst.msk [vmem:[%s1987_s22 + $0x20] sm:$0xff] %vm2556_vm12, %v1226_v11 }
 0x1ca   : > { %1241 = vst.msk [vmem:[%s1987_s22 + $0x10] sm:$0xff] %vm2557_vm13, %v1224_v1  ;;  %v1194_v8 = vpop.xlane.xlu1 %1193 }
 0x1cb   : > { %v1228_v13 = vadd.f32 %v1194_v8, %v1164_v6  ;;  %v1185_v9 = vpop.xlane.xlu0 %1184 }
 0x1cc   : > { %v1225_v7 = vadd.f32 %v1185_v9, %v1161_v2  ;;  %v914_v2 = vld [vmem:[%s1934_s19 + $0x48] sm:$0xff]  ;;  %v913_v9 = vld [vmem:[%s1934_s19 + $0x40] sm:$0xff] }
 0x1cd   : > { %1245 = vst.msk [vmem:[%s1987_s22 + $0x30] sm:$0xff] %vm2558_vm14, %v1228_v13 }
 0x1ce   : > { %1242 = vst.msk [vmem:[%s1987_s22 + $0x18] sm:$0xff] %vm2559_vm15, %v1225_v7  ;;  %v1200_v41 = vpop.xlane.xlu1 %1199 }
 0x1cf   : > { %v1230_v26 = vadd.f32 %v1200_v41, %v1166_v17  ;;  %v1191_v5 = vpop.xlane.xlu0 %1190 }
 0x1d0   : > { %v1227_v42 = vadd.f32 %v1191_v5, %v1163_v16  ;;  %v916_v16 = vld [vmem:[%s1934_s19 + $0x58] sm:$0xff]  ;;  %v915_v5 = vld [vmem:[%s1934_s19 + $0x50] sm:$0xff] }
 0x1d1   : > { %1247 = vst.msk [vmem:[%s1987_s22 + $0x40] sm:$0xff] %vm2560_vm3, %v1230_v26 }
 0x1d2   : > { %1244 = vst.msk [vmem:[%s1987_s22 + $0x28] sm:$0xff] %vm2561_vm4, %v1227_v42  ;;  %v1206_v25 = vpop.xlane.xlu1 %1205 }
 0x1d3   : > { %v1232_v44 = vadd.f32 %v1206_v25, %v1168_v4  ;;  %v1197_v62 = vpop.xlane.xlu0 %1196 }
 0x1d4   : > { %v1229_v18 = vadd.f32 %v1197_v62, %v1165_v43  ;;  %v918_v43 = vld [vmem:[%s1934_s19 + $0x68] sm:$0xff]  ;;  %v917_v62 = vld [vmem:[%s1934_s19 + $0x60] sm:$0xff] }
 0x1d5   : > { %1249 = vst.msk [vmem:[%s1987_s22 + $0x50] sm:$0xff] %vm2562_vm5, %v1232_v44 }
 0x1d6   : > { %1246 = vst.msk [vmem:[%s1987_s22 + $0x38] sm:$0xff] %vm2563_vm6, %v1229_v18  ;;  %v1212_v45 = vpop.xlane.xlu1 %1211 }
 0x1d7   : > { %v1234_v20 = vadd.f32 %v1212_v45, %v1170_v14  ;;  %v1203_v46 = vpop.xlane.xlu0 %1202 }
 0x1d8   : > { %v1231_v21 = vadd.f32 %v1203_v46, %v1167_v19  ;;  %v920_v19 = vld [vmem:[%s1934_s19 + $0x78] sm:$0xff]  ;;  %v919_v46 = vld [vmem:[%s1934_s19 + $0x70] sm:$0xff] }
 0x1d9   : > { %1251 = vst.msk [vmem:[%s1987_s22 + $0x60] sm:$0xff] %vm2564_vm7, %v1234_v20 }
 0x1da   : > { %1248 = vst.msk [vmem:[%s1987_s22 + $0x48] sm:$0xff] %vm2565_vm0, %v1231_v21  ;;  %v1218_v47 = vpop.xlane.xlu1 %1217 }
 0x1db   : > { %v1236_v48 = vadd.f32 %v1218_v47, %v1172_v22  ;;  %v1209_v49 = vpop.xlane.xlu0 %1208 }
 0x1dc   : > { %v1233_v23 = vadd.f32 %v1209_v49, %v1169_v36 }
 0x1dd   : > { %1253 = vst.msk [vmem:[%s1987_s22 + $0x70] sm:$0xff] %vm2566_vm8, %v1236_v48 }
 0x1de   : > { %1250 = vst.msk [vmem:[%s1987_s22 + $0x58] sm:$0xff] %vm2567_vm9, %v1233_v23  ;;  %v1275_v51 = vpop.xlane.xlu1 %1274 }
 0x1df   : > { %v1215_v52 = vpop.xlane.xlu0 %1214  ;;  %v1276_v28 = vadd.f32 %v1275_v51, %v1255_v24 }
 0x1e0   : > { %v1235_v29 = vadd.f32 %v1215_v52, %v1171_v50 }
 0x1e1   : > { %1278 = vst.msk [vmem:[%s2377_s12] sm:$0x1] %vm902_vm10, %v1276_v28 }
 0x1e2   : > { %1252 = vst.msk [vmem:[%s1987_s22 + $0x68] sm:$0xff] %vm2568_vm2, %v1235_v29 }
 0x1e3   : > { %v1221_v54 = vpop.xlane.xlu0 %1220 }
 0x1e4   : > { %v1237_v55 = vadd.f32 %v1221_v54, %v1173_v53 }
 0x1e6   : > { %1254 = vst.msk [vmem:[%s1987_s22 + $0x78] sm:$0xff] %vm2569_vm1, %v1237_v55 }
 0x1e7   : > { %v1282_v31 = vpop.xlane.xlu0 %1281 }
 0x1e8   : > { %v1283_v56 = vadd.f32 %v1282_v31, %v1279_v30 }
 0x1ea   : > { %1284 = vst.msk [vmem:[%s2368_s9] sm:$0x1] %vm902_vm10, %v1283_v56  ;;  %vm2571_vm10 = vmmov %vm2570_vm11 }
 0x1eb   : > { %vm2572_vm12 = vmmov %vm2571_vm10 }
 0x1ec   : > { %vm2573_vm13 = vmmov %vm2571_vm10 }
 0x1ed   : > { %vm2574_vm14 = vmmov %vm2571_vm10 }
 0x1ee   : > { %vm2575_vm15 = vmmov %vm2571_vm10 }
 0x1ef   : > { %vm2576_vm3 = vmmov %vm2571_vm10 }
 0x1f0   : > { %vm2577_vm4 = vmmov %vm2576_vm3 }
 0x1f1   : > { %vm2578_vm5 = vmmov %vm2576_vm3 }
 0x1f2   : > { %vm2579_vm6 = vmmov %vm2576_vm3 }
 0x1f3   : > { %vm2580_vm7 = vmmov %vm2576_vm3 }
 0x1f4   : > { %vm2581_vm0 = vmmov %vm2576_vm3 }
 0x1f5   : > { %vm2582_vm8 = vmmov %vm2581_vm0 }
 0x1f6   : > { %vm2583_vm9 = vmmov %vm2581_vm0 }
 0x1f7   : > { %vm2584_vm2 = vmmov %vm2581_vm0 }
 0x1f8   : > { %vm2585_vm1 = vmmov %vm2581_vm0 }
 0x1f9   : > { %v1625_v32 = vpop.f32.mrf.mxu1 }
 0x1fa   : > { %v1622_v59 = vpop.f32.mrf.mxu0  ;;  %v1129_v60 = vadd.f32 %v1625_v32, %v908_v57 }
 0x1fb   : > { %v1127_v3 = vadd.f32 %v1622_v59, %v906_v58  ;;  %v1057_v10 = vpop.f32.mrf.mxu1 }
 0x1fc   : > { %1145 = vst.msk [vmem:[%s1934_s19 + $0x18] sm:$0xff] %vm2570_vm11, %v1129_v60  ;;  %v1047_v27 = vpop.f32.mrf.mxu0  ;;  %v1128_v35 = vadd.f32 %v1057_v10, %v907_v33 }
 0x1fd   : > { %1143 = vst.msk [vmem:[%s1934_s19 + $0x8] sm:$0xff] %vm2571_vm10, %v1127_v3  ;;  %v1126_v38 = vadd.f32 %v1047_v27, %v905_v34  ;;  %v1628_v39 = vpop.f32.mrf.mxu1 }
 0x1fe   : > { %1144 = vst.msk [vmem:[%s1934_s19 + $0x10] sm:$0xff] %vm2572_vm12, %v1128_v35  ;;  %v1131_v0 = vadd.f32 %v1628_v39, %v910_v15 }
 0x1ff   : > { %1142 = vst.msk [vmem:[%s1934_s19] sm:$0xff] %vm2573_vm13, %v1126_v38  ;;  %v1067_v63 = vpop.f32.mrf.mxu1 }
 0x200   : > { %1147 = vst.msk [vmem:[%s1934_s19 + $0x28] sm:$0xff] %vm2574_vm14, %v1131_v0  ;;  %v1130_v37 = vadd.f32 %v1067_v63, %v909_v40 }
 0x201   : > { %v1631_v11 = vpop.f32.mrf.mxu1 }
 0x202   : > { %1146 = vst.msk [vmem:[%s1934_s19 + $0x20] sm:$0xff] %vm2575_vm15, %v1130_v37  ;;  %v1133_v1 = vadd.f32 %v1631_v11, %v912_v12 }
 0x203   : > { %v1077_v6 = vpop.f32.mrf.mxu1 }
 0x204   : > { %1149 = vst.msk [vmem:[%s1934_s19 + $0x38] sm:$0xff] %vm2576_vm3, %v1133_v1  ;;  %v1132_v8 = vadd.f32 %v1077_v6, %v911_v61 }
 0x205   : > { %v1634_v13 = vpop.f32.mrf.mxu1 }
 0x206   : > { %1148 = vst.msk [vmem:[%s1934_s19 + $0x30] sm:$0xff] %vm2577_vm4, %v1132_v8  ;;  %v1135_v7 = vadd.f32 %v1634_v13, %v914_v2 }
 0x207   : > { %v1087_v17 = vpop.f32.mrf.mxu1 }
 0x208   : > { %1151 = vst.msk [vmem:[%s1934_s19 + $0x48] sm:$0xff] %vm2578_vm5, %v1135_v7  ;;  %v1134_v41 = vadd.f32 %v1087_v17, %v913_v9 }
 0x209   : > { %v1637_v26 = vpop.f32.mrf.mxu1 }
 0x20a   : > { %1150 = vst.msk [vmem:[%s1934_s19 + $0x40] sm:$0xff] %vm2579_vm6, %v1134_v41  ;;  %v1137_v42 = vadd.f32 %v1637_v26, %v916_v16 }
 0x20b   : > { %v1097_v4 = vpop.f32.mrf.mxu1 }
 0x20c   : > { %1153 = vst.msk [vmem:[%s1934_s19 + $0x58] sm:$0xff] %vm2580_vm7, %v1137_v42  ;;  %v1136_v25 = vadd.f32 %v1097_v4, %v915_v5 }
 0x20d   : > { %v1640_v44 = vpop.f32.mrf.mxu1 }
 0x20e   : > { %1152 = vst.msk [vmem:[%s1934_s19 + $0x50] sm:$0xff] %vm2581_vm0, %v1136_v25  ;;  %v1139_v18 = vadd.f32 %v1640_v44, %v918_v43 }
 0x20f   : > { %v1107_v14 = vpop.f32.mrf.mxu1 }
 0x210   : > { %1155 = vst.msk [vmem:[%s1934_s19 + $0x68] sm:$0xff] %vm2582_vm8, %v1139_v18  ;;  %v1138_v45 = vadd.f32 %v1107_v14, %v917_v62 }
 0x211   : > { %v1643_v20 = vpop.f32.mrf.mxu1 }
 0x212   : > { %1154 = vst.msk [vmem:[%s1934_s19 + $0x60] sm:$0xff] %vm2583_vm9, %v1138_v45  ;;  %v1141_v21 = vadd.f32 %v1643_v20, %v920_v19 }
 0x213   : > { %v1117_v22 = vpop.f32.mrf.mxu1 }
 0x214   : > { %1157 = vst.msk [vmem:[%s1934_s19 + $0x78] sm:$0xff] %vm2584_vm2, %v1141_v21  ;;  %v1140_v36 = vadd.f32 %v1117_v22, %v919_v46 }
 0x216   : > { %1156 = vst.msk [vmem:[%s1934_s19 + $0x70] sm:$0xff] %vm2585_vm1, %v1140_v36 }
 0x217 PF: > { %s18_s26 = sadd.s32 1, %s1702_s26   ;;  %s2586_s24 = smov %s1698_s25 }
 0x218   : > { %p15_p5 = scmp.ge.s32.totalorder %s18_s26, 4   ;;  %s2587_s25 = smov %s2589_s27 }
 0x21a   :  { %17 = sbr.rel (!%p15_p5) target bundleno = 2 (0x2), region = 114 }

// kernel: _lambda_.3
= control target key start
LH: loop header
LB: loop body
LE: loop exit
PB: predicated region body
PF: predicated region fallthrough
CT: control target
= control target key end

     0   :  { %s908_s18 = smov 0   ;;  %s910_s19 = smov 0   ;;  %s1087_s0 = inlined_call_operand.vmem [shape: s32[2,1,64], index: 0, kind: input, shape index: {}]   ;;  %s1088_s1 = inlined_call_operand.vmem [shape: f32[32,128], index: 1, kind: input, shape index: {}]   ;;  %s1089_s2 = inlined_call_operand.vmem [shape: f32[2,32,64], index: 2, kind: input, shape index: {}]   ;;  %s1090_s3 = inlined_call_operand.vmem [shape: f32[2,32,64], index: 3, kind: output, shape index: {0}]   ;;  %s1091_s4 = inlined_call_operand.vmem [shape: f32[2,32,64], index: 4, kind: output, shape index: {1}]   ;;  %s1092_s5 = inlined_call_operand.vmem [shape: f32[2,1,1], index: 5, kind: output, shape index: {2}]  }
   0x1   :  { %s912_s20 = smov 0  }
   0x2 LB: > { %s28_s21 = sadd.s32 1, %s870_s19  ;;  %p691_p0 = scmp.ge.s32.totalorder %s874_s20, 1  ;;  %s874_s20 = sphi %s912_s20, %s16_s20   ;;  %s870_s19 = sphi %s910_s19, %s1094_s19   ;;  %s866_s18 = sphi %s908_s18, %s1093_s18  }
   0x3   : > { %p30_p1 = scmp.ge.s32.totalorder %s28_s21, 2  ;;  %p226_p2 = scmp.lt.s32.totalorder %s874_s20, 3 }
   0x5   : > { %s1096_s21 = smov (%p30_p1, %s28_s21), 0  ;;  %p227_p3 = pnand %p691_p0, %p226_p2 }
   0x6   : > { %p277_p4 = scmp.lt.s32.totalorder (!%p227_p3), %s866_s18, 1 }
   0x7   : > { %230 = sbr.rel (%p227_p3) target bundleno = 412 (0x19c), region = 32 }
   0xc   : > { %v319_v0 = vlaneseq  ;;  %v311_v1 = vld [vmem:[%s1088_s1] sm:$0xff]  ;;  %v313_v2 = vld [vmem:[%s1088_s1 + $0x10] sm:$0xff]  ;;  %s1098_s18 = smov (!%p277_p4, %s866_s18), 1  ;;  %v876_v9 = vmov 1.0   ;;  %v312_v21 = vld [vmem:[%s1088_s1 + $0x8] sm:$0xff]  ;;  %v877_v23 = vmov 0.0  }
   0xd   : > { %788 = vmatprep.mubr.f32.mxu0 %v311_v1  ;;  %791 = vmatprep.mubr.f32.mxu1 %v313_v2  ;;  %s282_s28 = scalar_lea.vmem %s1087_s0, %s1098_s18  ;;  %v314_v22 = vld [vmem:[%s1088_s1 + $0x18] sm:$0xff]  ;;  %s1048_s10 = scalar_lea.vmem %s1092_s5, %s1098_s18 }
   0xe   : > { %v934_v3 = vshrl.u32 %v319_v0, 7  ;;  %v943_v7 = vld [vmem:[%s282_s28] ss:$0 sm:$0xff]  ;;  %s733_s11 = sshll.u32 %s1098_s18, 5 }
   0xf   : > { %s290_s14 = scalar_lea.vmem %s1089_s2, %s733_s11  ;;  %s298_s17 = scalar_lea.vmem %s1090_s3, %s733_s11 }
  0x10   : > { %v335_v4 = vadd.s32 120, %v934_v3  ;;  %v334_v5 = vadd.s32 112, %v934_v3  ;;  %v333_v6 = vadd.s32 104, %v934_v3  ;;  %v332_v8 = vadd.s32 96, %v934_v3  ;;  %v316_v24 = vld [vmem:[%s290_s14 + $0x8] sm:$0xff]  ;;  %v318_v25 = vld [vmem:[%s290_s14 + $0x18] sm:$0xff]  ;;  %s306_s23 = scalar_lea.vmem %s1091_s4, %s733_s11 }
  0x11   : > { %v331_v10 = vadd.s32 88, %v934_v3  ;;  %v330_v11 = vadd.s32 80, %v934_v3  ;;  %v329_v12 = vadd.s32 72, %v934_v3  ;;  %v328_v13 = vadd.s32 64, %v934_v3  ;;  %v315_v30 = vld [vmem:[%s290_s14] sm:$0xff]  ;;  %v317_v31 = vld [vmem:[%s290_s14 + $0x10] sm:$0xff] }
  0x12   : > { %vm355_vm0 = vcmp.eq.s32.totalorder %v335_v4, %v943_v7  ;;  %vm354_vm1 = vcmp.eq.s32.totalorder %v334_v5, %v943_v7  ;;  %vm353_vm2 = vcmp.eq.s32.totalorder %v333_v6, %v943_v7  ;;  %vm352_vm3 = vcmp.eq.s32.totalorder %v332_v8, %v943_v7 }
  0x13   : > { %756 = vmatprep.subr.msk.mxu0 %vm355_vm0, %v876_v9  ;;  %794 = vmatprep.subr.msk.mxu1 %vm355_vm0, %v876_v9  ;;  %vm351_vm4 = vcmp.eq.s32.totalorder %v331_v10, %v943_v7  ;;  %vm350_vm5 = vcmp.eq.s32.totalorder %v330_v11, %v943_v7  ;;  %vm349_vm6 = vcmp.eq.s32.totalorder %v329_v12, %v943_v7  ;;  %v327_v14 = vadd.s32 56, %v934_v3 }
  0x14   : > { %757 = vmatpush3.msk.msra.mxu0 %vm355_vm0, %v876_v9  ;;  %810 = vmatpush3.msk.msra.mxu1 %vm355_vm0, %v876_v9  ;;  %vm348_vm7 = vcmp.eq.s32.totalorder %v328_v13, %v943_v7  ;;  %v326_v15 = vadd.s32 48, %v934_v3  ;;  %v325_v16 = vadd.s32 40, %v934_v3  ;;  %v324_v17 = vadd.s32 32, %v934_v3 }
  0x15   : > { %758 = vmatprep.subr.msk.mxu0 %vm354_vm1, %v876_v9  ;;  %795 = vmatprep.subr.msk.mxu1 %vm354_vm1, %v876_v9  ;;  %vm347_vm8 = vcmp.eq.s32.totalorder %v327_v14, %v943_v7  ;;  %v323_v18 = vadd.s32 24, %v934_v3  ;;  %v322_v19 = vadd.s32 16, %v934_v3  ;;  %v321_v20 = vadd.s32 8, %v934_v3 }
  0x16   : > { %759 = vmatpush3.msk.msra.mxu0 %vm354_vm1, %v876_v9  ;;  %811 = vmatpush3.msk.msra.mxu1 %vm354_vm1, %v876_v9  ;;  %vm346_vm9 = vcmp.eq.s32.totalorder %v326_v15, %v943_v7  ;;  %vm345_vm10 = vcmp.eq.s32.totalorder %v325_v16, %v943_v7  ;;  %vm344_vm11 = vcmp.eq.s32.totalorder %v324_v17, %v943_v7  ;;  %vm494_vm0 = vcmask 0  }
  0x17   : > { %760 = vmatprep.subr.msk.mxu0 %vm353_vm2, %v876_v9  ;;  %796 = vmatprep.subr.msk.mxu1 %vm353_vm2, %v876_v9  ;;  %vm343_vm12 = vcmp.eq.s32.totalorder %v323_v18, %v943_v7  ;;  %vm342_vm13 = vcmp.eq.s32.totalorder %v322_v19, %v943_v7  ;;  %vm341_vm14 = vcmp.eq.s32.totalorder %v321_v20, %v943_v7  ;;  %vm473_vm1 = vcmask 523264  }
  0x18   : > { %761 = vmatpush3.msk.msra.mxu0 %vm353_vm2, %v876_v9  ;;  %812 = vmatpush3.msk.msra.mxu1 %vm353_vm2, %v876_v9  ;;  %vm340_vm15 = vcmp.eq.s32.totalorder %v934_v3, %v943_v7  ;;  %495 = vst.msk [vmem:[%s1048_s10] sm:$0x1] %vm494_vm0, %v877_v23 }
  0x19   : > { %762 = vmatprep.subr.msk.mxu0 %vm352_vm3, %v876_v9  ;;  %797 = vmatprep.subr.msk.mxu1 %vm352_vm3, %v876_v9 }
  0x1a   : > { %763 = vmatpush3.msk.msra.mxu0 %vm352_vm3, %v876_v9  ;;  %813 = vmatpush3.msk.msra.mxu1 %vm352_vm3, %v876_v9 }
  0x1b   : > { %764 = vmatprep.subr.msk.mxu0 %vm351_vm4, %v876_v9  ;;  %798 = vmatprep.subr.msk.mxu1 %vm351_vm4, %v876_v9 }
  0x1c   : > { %765 = vmatpush3.msk.msra.mxu0 %vm351_vm4, %v876_v9  ;;  %814 = vmatpush3.msk.msra.mxu1 %vm351_vm4, %v876_v9 }
  0x1d   : > { %766 = vmatprep.subr.msk.mxu0 %vm350_vm5, %v876_v9  ;;  %799 = vmatprep.subr.msk.mxu1 %vm350_vm5, %v876_v9 }
  0x1e   : > { %767 = vmatpush3.msk.msra.mxu0 %vm350_vm5, %v876_v9  ;;  %815 = vmatpush3.msk.msra.mxu1 %vm350_vm5, %v876_v9 }
  0x1f   : > { %768 = vmatprep.subr.msk.mxu0 %vm349_vm6, %v876_v9  ;;  %800 = vmatprep.subr.msk.mxu1 %vm349_vm6, %v876_v9  ;;  %v496_v58 = vld [vmem:[%s1048_s10] sm:$0x1] }
  0x20   : > { %769 = vmatpush3.msk.msra.mxu0 %vm349_vm6, %v876_v9  ;;  %816 = vmatpush3.msk.msra.mxu1 %vm349_vm6, %v876_v9 }
  0x21   : > { %770 = vmatprep.subr.msk.mxu0 %vm348_vm7, %v876_v9  ;;  %801 = vmatprep.subr.msk.mxu1 %vm348_vm7, %v876_v9 }
  0x22   : > { %771 = vmatpush3.msk.msra.mxu0 %vm348_vm7, %v876_v9  ;;  %817 = vmatpush3.msk.msra.mxu1 %vm348_vm7, %v876_v9 }
  0x23   : > { %772 = vmatprep.subr.msk.mxu0 %vm347_vm8, %v876_v9  ;;  %802 = vmatprep.subr.msk.mxu1 %vm347_vm8, %v876_v9 }
  0x24   : > { %773 = vmatpush3.msk.msra.mxu0 %vm347_vm8, %v876_v9  ;;  %818 = vmatpush3.msk.msra.mxu1 %vm347_vm8, %v876_v9 }
  0x25   : > { %774 = vmatprep.subr.msk.mxu0 %vm346_vm9, %v876_v9  ;;  %803 = vmatprep.subr.msk.mxu1 %vm346_vm9, %v876_v9 }
  0x26   : > { %775 = vmatpush3.msk.msra.mxu0 %vm346_vm9, %v876_v9  ;;  %819 = vmatpush3.msk.msra.mxu1 %vm346_vm9, %v876_v9 }
  0x27   : > { %776 = vmatprep.subr.msk.mxu0 %vm345_vm10, %v876_v9  ;;  %804 = vmatprep.subr.msk.mxu1 %vm345_vm10, %v876_v9 }
  0x28   : > { %777 = vmatpush3.msk.msra.mxu0 %vm345_vm10, %v876_v9  ;;  %820 = vmatpush3.msk.msra.mxu1 %vm345_vm10, %v876_v9 }
  0x29   : > { %778 = vmatprep.subr.msk.mxu0 %vm344_vm11, %v876_v9  ;;  %805 = vmatprep.subr.msk.mxu1 %vm344_vm11, %v876_v9 }
  0x2a   : > { %779 = vmatpush3.msk.msra.mxu0 %vm344_vm11, %v876_v9  ;;  %821 = vmatpush3.msk.msra.mxu1 %vm344_vm11, %v876_v9 }
  0x2b   : > { %780 = vmatprep.subr.msk.mxu0 %vm343_vm12, %v876_v9  ;;  %806 = vmatprep.subr.msk.mxu1 %vm343_vm12, %v876_v9 }
  0x2c   : > { %781 = vmatpush3.msk.msra.mxu0 %vm343_vm12, %v876_v9  ;;  %822 = vmatpush3.msk.msra.mxu1 %vm343_vm12, %v876_v9 }
  0x2d   : > { %782 = vmatprep.subr.msk.mxu0 %vm342_vm13, %v876_v9  ;;  %807 = vmatprep.subr.msk.mxu1 %vm342_vm13, %v876_v9 }
  0x2e   : > { %783 = vmatpush3.msk.msra.mxu0 %vm342_vm13, %v876_v9  ;;  %823 = vmatpush3.msk.msra.mxu1 %vm342_vm13, %v876_v9 }
  0x2f   : > { %784 = vmatprep.subr.msk.mxu0 %vm341_vm14, %v876_v9  ;;  %808 = vmatprep.subr.msk.mxu1 %vm341_vm14, %v876_v9 }
  0x30   : > { %785 = vmatpush3.msk.msra.mxu0 %vm341_vm14, %v876_v9  ;;  %824 = vmatpush3.msk.msra.mxu1 %vm341_vm14, %v876_v9 }
  0x31   : > { %786 = vmatprep.subr.msk.mxu0 %vm340_vm15, %v876_v9  ;;  %809 = vmatprep.subr.msk.mxu1 %vm340_vm15, %v876_v9 }
  0x32   : > { %787 = vmatpush3.msk.msra.mxu0 %vm340_vm15, %v876_v9  ;;  %825 = vmatpush3.msk.msra.mxu1 %vm340_vm15, %v876_v9 }
  0x33   : > { %789 = vmatmul.mubr.f32.vlgmr.msra.gmra.mxu0 %v312_v21  ;;  %792 = vmatmul.mubr.f32.vlgmr.msra.gmra.mxu1 %v314_v22 }
  0xf3   : > { %v790_v26 = vpop.f32.mrf.mxu0  ;;  %v793_v27 = vpop.f32.mrf.mxu1 }
  0xf4   : > { %475 = vst.msk [vmem:[%s298_s17 + $0x8] sm:$0xff] %vm473_vm1, %v790_v26  ;;  %v479_v28 = vsub.f32 %v790_v26, %v316_v24  ;;  %477 = vst.msk [vmem:[%s298_s17 + $0x18] sm:$0xff] %vm473_vm1, %v793_v27  ;;  %v481_v29 = vsub.f32 %v793_v27, %v318_v25 }
  0xf5   : > { %v454_v32 = vpop.f32.mrf.mxu0  ;;  %v464_v33 = vpop.f32.mrf.mxu1 }
  0xf6   : > { %v483_v34 = vadd.f32 %v479_v28, %v316_v24  ;;  %v485_v35 = vadd.f32 %v481_v29, %v318_v25  ;;  %474 = vst.msk [vmem:[%s298_s17] sm:$0xff] %vm473_vm1, %v454_v32  ;;  %476 = vst.msk [vmem:[%s298_s17 + $0x10] sm:$0xff] %vm473_vm1, %v464_v33  ;;  %v498_v36 = vmul.f32 %v479_v28, %v479_v28 }
  0xf7   : > { %v478_v37 = vsub.f32 %v454_v32, %v315_v30  ;;  %v480_v38 = vsub.f32 %v464_v33, %v317_v31  ;;  %v500_v44 = vmul.f32 %v481_v29, %v481_v29 }
  0xf8   : > { %487 = vst.msk [vmem:[%s306_s23 + $0x8] sm:$0xff] %vm473_vm1, %v483_v34  ;;  %489 = vst.msk [vmem:[%s306_s23 + $0x18] sm:$0xff] %vm473_vm1, %v485_v35  ;;  %v502_v43 = vsel %vm473_vm1, %v498_v36, 0.0 }
  0xf9   : > { %v482_v39 = vadd.f32 %v478_v37, %v315_v30  ;;  %v497_v40 = vmul.f32 %v478_v37, %v478_v37  ;;  %v484_v41 = vadd.f32 %v480_v38, %v317_v31  ;;  %v499_v42 = vmul.f32 %v480_v38, %v480_v38 }
  0xfa   : > { %v506_v49 = vsel %vm473_vm1, %v500_v44, 0.0 }
  0xfb   : > { %486 = vst.msk [vmem:[%s306_s23] sm:$0xff] %vm473_vm1, %v482_v39  ;;  %v501_v45 = vsel %vm473_vm1, %v497_v40, 0.0  ;;  %488 = vst.msk [vmem:[%s306_s23 + $0x10] sm:$0xff] %vm473_vm1, %v484_v41  ;;  %v504_v47 = vsel %vm473_vm1, %v499_v42, 0.0 }
  0xfc   : > { %v503_v46 = vadd.f32 %v502_v43, %v501_v45 }
  0xfe   : > { %v505_v48 = vadd.f32 %v504_v47, %v503_v46 }
 0x100   : > { %v507_v50 = vadd.f32 %v506_v49, %v505_v48 }
 0x102   : > { %v508_v51 = vrot.slane %v507_v50, 4 }
 0x104   : > { %v509_v52 = vadd.f32 %v508_v51, %v507_v50 }
 0x106   : > { %v510_v53 = vrot.slane %v509_v52, 2 }
 0x108   : > { %v511_v54 = vadd.f32 %v510_v53, %v509_v52 }
 0x10a   : > { %v512_v55 = vrot.slane %v511_v54, 1 }
 0x10c   : > { %v513_v56 = vadd.f32 %v512_v55, %v511_v54 }
 0x10e   : > { %v514_v57 = vsel %vm473_vm1, %v513_v56, 0.0 }
 0x10f   : > { %515 = vadd.xlane.f32.xlu0 %v514_v57 }
 0x198   : > { %v516_v59 = vpop.xlane.xlu0 %515 }
 0x199   : > { %v517_v60 = vadd.f32 %v516_v59, %v496_v58 }
 0x19b   : > { %519 = vst.msk [vmem:[%s1048_s10] sm:$0x1] %vm494_vm0, %v517_v60 }
 0x19c PF: > { %s16_s20 = sadd.s32 1, %s874_s20   ;;  %s1093_s18 = smov %s870_s19 }
 0x19d   : > { %p13_p5 = scmp.ge.s32.totalorder %s16_s20, 4   ;;  %s1094_s19 = smov %s1096_s21 }
 0x19f   :  { %15 = sbr.rel (!%p13_p5) target bundleno = 2 (0x2), region = 93 }

</bundles_post_ra>
